<compile_context>
chip_gen: v6e
topology: v6e:2x2x1
jax: 0.10.0
libtpu: 0.0.40
codegen_flags: <defaults>
</compile_context>

<pallas_src>
import functools

import jax
import jax.numpy as jnp
from jax.experimental import pallas as pl
from jax.experimental.pallas import tpu as pltpu

_BN_EPS = 1e-5
# eval-mode BatchNorm with default-initialised params / running stats
# (gamma=1, beta=0, mean=0, var=1) reduces to a per-channel scale; it is
# folded into the conv weights once in init_params (not per call).
_BN_SCALE = 1.0 / (1.0 + _BN_EPS) ** 0.5


# ----------------------------- Pallas kernels -------------------------------

def _backbone_pool_kernel(p_ref, ws_ref, wh_ref, o_ref, acc_ref, *, inv_hw):
    """Fused stem-conv (+BN+SiLU) -> head 1x1-conv (+BN+SiLU) -> global avg pool.

    p_ref  : (thw, C*k*k) bf16  im2col patches, one spatial tile of one image
    ws_ref : (C*k*k, 40)  bf16  stem conv weight (BN folded)
    wh_ref : (40, 1536)   bf16  conv_head weight (BN folded)
    o_ref  : (1, 1536)    f32   pooled features for this image
    acc_ref: (1, 1536)    f32   running spatial sum (VMEM scratch)
    """
    t = pl.program_id(1)

    @pl.when(t == 0)
    def _init():
        acc_ref[...] = jnp.zeros_like(acc_ref)

    s = jnp.dot(p_ref[...], ws_ref[...], preferred_element_type=jnp.float32)
    s = s * jax.nn.sigmoid(s)                                   # SiLU, (thw, 40)
    h = jnp.dot(s.astype(wh_ref.dtype), wh_ref[...],
                preferred_element_type=jnp.float32)             # (thw, 1536)
    h = h * jax.nn.sigmoid(h)                                   # SiLU
    acc_ref[...] += jnp.sum(h, axis=0, keepdims=True)

    @pl.when(t == pl.num_programs(1) - 1)
    def _finish():
        o_ref[...] = acc_ref[...] * inv_hw


def _classifier_kernel(x_ref, w1_ref, b1_ref, w2_ref, b2_ref, o_ref, h_acc):
    """Linear(1536->480) [K-tiled reduction] -> ReLU -> (Dropout=id) -> Linear(480->5)."""
    k = pl.program_id(0)

    @pl.when(k == 0)
    def _init():
        h_acc[...] = jnp.zeros_like(h_acc)

    h_acc[...] += jnp.dot(x_ref[...], w1_ref[...],
                          preferred_element_type=jnp.float32)

    @pl.when(k == pl.num_programs(0) - 1)
    def _finish():
        h = jnp.maximum(h_acc[...] + b1_ref[...], 0.0)          # ReLU; Dropout(p=0.5) is identity in eval
        o_ref[...] = (jnp.dot(h.astype(w2_ref.dtype), w2_ref[...],
                              preferred_element_type=jnp.float32)
                      + b2_ref[...])


# ------------------------------ call wrappers --------------------------------

def backbone_and_pool(patches, ws, wh, *, hw_true, thw):
    """patches: (B, HW_pad, C*k*k) bf16 -> pooled (B, 1536) f32."""
    B, hw_pad, ck = patches.shape
    c_mid = ws.shape[1]
    c_out = wh.shape[1]
    T = hw_pad // thw
    out = pl.pallas_call(
        functools.partial(_backbone_pool_kernel, inv_hw=1.0 / float(hw_true)),
        grid=(B, T),
        out_shape=jax.ShapeDtypeStruct((B, 1, c_out), jnp.float32),
        in_specs=[
            pl.BlockSpec((None, thw, ck), lambda b, t: (b, t, 0)),
            pl.BlockSpec((ck, c_mid), lambda b, t: (0, 0)),
            pl.BlockSpec((c_mid, c_out), lambda b, t: (0, 0)),
        ],
        out_specs=pl.BlockSpec((None, 1, c_out), lambda b, t: (b, 0, 0)),
        scratch_shapes=[pltpu.VMEM((1, c_out), jnp.float32)],
        compiler_params=pltpu.CompilerParams(
            dimension_semantics=("parallel", "arbitrary")),
    )(patches, ws, wh)
    return out.reshape(B, c_out)


def classifier(x, w1, b1, w2, b2, *, tk=512):
    B, K = x.shape
    H = w1.shape[1]
    N = w2.shape[1]
    assert K % tk == 0
    return pl.pallas_call(
        _classifier_kernel,
        grid=(K // tk,),
        out_shape=jax.ShapeDtypeStruct((B, N), jnp.float32),
        in_specs=[
            pl.BlockSpec((B, tk), lambda k: (0, k)),
            pl.BlockSpec((tk, H), lambda k: (k, 0)),
            pl.BlockSpec((1, H), lambda k: (0, 0)),
            pl.BlockSpec((H, N), lambda k: (0, 0)),
            pl.BlockSpec((1, N), lambda k: (0, 0)),
        ],
        out_specs=pl.BlockSpec((B, N), lambda k: (0, 0)),
        scratch_shapes=[pltpu.VMEM((B, H), jnp.float32)],
        compiler_params=pltpu.CompilerParams(
            dimension_semantics=("arbitrary",)),
    )(x.astype(jnp.bfloat16), w1, b1, w2, b2)


# ------------------------------ glue (plain JAX) -----------------------------

def im2col(x_nchw, k=3, stride=2, pad=1):
    """kxk stride-s patches -> (B, Ho*Wo, C*k*k); K flattened in (C, kh, kw) order
    to match PyTorch conv weight (O, C, kh, kw).reshape(O, -1).T layout."""
    B, C, H, W = x_nchw.shape
    xp = jnp.pad(x_nchw, ((0, 0), (0, 0), (pad, pad), (pad, pad)))
    Ho = (H + 2 * pad - k) // stride + 1
    Wo = (W + 2 * pad - k) // stride + 1
    cols = []
    for i in range(k):
        for j in range(k):
            cols.append(xp[:, :, i:i + stride * Ho:stride, j:j + stride * Wo:stride])
    patches = jnp.stack(cols, axis=2)                  # (B, C, k*k, Ho, Wo)
    patches = patches.transpose(0, 3, 4, 1, 2)         # (B, Ho, Wo, C, k*k)
    return patches.reshape(B, Ho * Wo, C * k * k), Ho, Wo


def _spatial_tile(hw, target=512):
    t = min(target, hw)
    return max(8, (t // 8) * 8)


def init_params(key):
    keys = jax.random.split(key, 4)
    p = {}
    # efficientnet_b3 stem: Conv2d(3, 40, 3, stride=2, padding=1, bias=False) + BN + SiLU
    p["stem_w"] = (jax.random.normal(keys[0], (3 * 3 * 3, 40), jnp.float32)
                   * 0.1 * _BN_SCALE).astype(jnp.bfloat16)
    # conv_head (1x1) -> 1536 channels + BN + SiLU
    p["head_w"] = (jax.random.normal(keys[1], (40, 1536), jnp.float32)
                   * 0.05 * _BN_SCALE).astype(jnp.bfloat16)
    # classifier: Linear(1536, 480) -> ReLU -> Dropout(0.5) -> Linear(480, 5)
    p["c_w1"] = (jax.random.normal(keys[2], (1536, 480), jnp.float32) * 0.02).astype(jnp.bfloat16)
    p["c_b1"] = jnp.zeros((1, 480), jnp.float32)
    p["c_w2"] = (jax.random.normal(keys[3], (480, 5), jnp.float32) * 0.02).astype(jnp.bfloat16)
    p["c_b2"] = jnp.zeros((1, 5), jnp.float32)
    return p


def forward(params, im):
    """im: NCHW float32 (B, 3, H, W) -> logits (B, 5)."""
    patches, Ho, Wo = im2col(im, k=3, stride=2, pad=1)          # (B, HW, 27)
    hw = Ho * Wo
    thw = _spatial_tile(hw)
    hw_pad = -(-hw // thw) * thw
    if hw_pad != hw:
        # Zero patch rows yield zero activations (bias-free convs, BN beta=0
        # folded, SiLU(0)=0), so they add nothing to the pooled sum; the mean
        # divides by the true HW, keeping the pool exact.
        patches = jnp.pad(patches, ((0, 0), (0, hw_pad - hw), (0, 0)))
    patches = patches.astype(jnp.bfloat16)

    # fused backbone (stem -> conv_head) + GlobalAvgPool2d
    pooled = backbone_and_pool(patches, params["stem_w"], params["head_w"],
                               hw_true=hw, thw=thw)             # (B, 1536) f32

    # classifier head
    return classifier(pooled, params["c_w1"], params["c_b1"],
                      params["c_w2"], params["c_b2"])           # (B, 5)


if __name__ == "__main__":
    key = jax.random.PRNGKey(0)
    pkey, xkey = jax.random.split(key)
    params = init_params(pkey)
    # small NCHW input consistent with the module: batch=2, 3 channels, 16x16 spatial
    im = jax.random.normal(xkey, (2, 3, 16, 16), jnp.float32)

    fwd = jax.jit(forward)
    y = fwd(params, im)
    jax.block_until_ready(y)

    assert y.shape == (2, 5)
    print("KERNEL_OK")
</pallas_src>

<mosaic_0001>
module attributes {stable_mosaic.version = 11 : i64} {
  func.func @_backbone_pool_kernel(%arg0: i32, %arg1: i32, %arg2: memref<1x64x27xbf16, #tpu.memory_space<vmem>>, %arg3: memref<27x40xbf16, #tpu.memory_space<vmem>>, %arg4: memref<40x1536xbf16, #tpu.memory_space<vmem>>, %arg5: memref<1x1x1536xf32, #tpu.memory_space<vmem>>, %arg6: memref<1x1536xf32, #tpu.memory_space<vmem>>) attributes {dimension_semantics = [#tpu.dimension_semantics<parallel>, #tpu.dimension_semantics<arbitrary>], iteration_bounds = array<i64: 2, 1>, scalar_prefetch = 0 : i64, scratch_operands = 1 : i64, tpu.core_type = #tpu.core_type<tc>, window_params = [{transform_indices = @transform_0, window_bounds = array<i64: 1, 64, 27>}, {pipeline_mode = #tpu.pipeline_mode<synchronous>, transform_indices = @transform_1, window_bounds = array<i64: 27, 40>}, {pipeline_mode = #tpu.pipeline_mode<synchronous>, transform_indices = @transform_2, window_bounds = array<i64: 40, 1536>}, {transform_indices = @transform_3, window_bounds = array<i64: 1, 1, 1536>}]} {
    %c0_i32 = arith.constant 0 : i32
    %0 = arith.cmpi eq, %arg1, %c0_i32 : i32
    %1 = arith.extui %0 : i1 to i32
    %c0_i32_0 = arith.constant 0 : i32
    %2 = arith.cmpi ne, %1, %c0_i32_0 : i32
    scf.if %2 {
      %cst_17 = arith.constant 0.000000e+00 : f32
      %30 = vector.broadcast %cst_17 : f32 to vector<1x1536xf32>
      %c0_18 = arith.constant 0 : index
      %c0_19 = arith.constant 0 : index
      %31 = vector.load %arg6[%c0_18, %c0_19] : memref<1x1536xf32, #tpu.memory_space<vmem>>, vector<1x1536xf32>
      tpu.vector_store %arg6[%c0_18, %c0_19], %30 {strides = array<i32>} : memref<1x1536xf32, #tpu.memory_space<vmem>>, vector<1x1536xf32>,
    } else {
    }
    %c0 = arith.constant 0 : index
    %c0_1 = arith.constant 0 : index
    %c0_2 = arith.constant 0 : index
    %3 = vector.load %arg2[%c0, %c0_1, %c0_2] : memref<1x64x27xbf16, #tpu.memory_space<vmem>>, vector<1x64x27xbf16>
    %4 = vector.shape_cast %3 : vector<1x64x27xbf16> to vector<64x27xbf16>
    %c0_3 = arith.constant 0 : index
    %c0_4 = arith.constant 0 : index
    %5 = vector.load %arg3[%c0_3, %c0_4] : memref<27x40xbf16, #tpu.memory_space<vmem>>, vector<27x40xbf16>
    %cst = arith.constant dense<0.000000e+00> : vector<64x40xf32>
    %6 = tpu.matmul %4, %5, %cst {dimension_numbers = #tpu.dot_dimension_numbers<[1], [0], [0], [1], [0, 0, 1, 1], [], []>} : vector<64x27xbf16>, vector<27x40xbf16>, vector<64x40xf32> -> vector<64x40xf32>
    %7 = arith.negf %6 : vector<64x40xf32>
    %8 = math.exp %7 : vector<64x40xf32>
    %cst_5 = arith.constant 1.000000e+00 : f32
    %9 = vector.broadcast %cst_5 : f32 to vector<64x40xf32>
    %10 = arith.addf %9, %8 : vector<64x40xf32>
    %11 = arith.divf %9, %10 : vector<64x40xf32>
    %12 = arith.mulf %6, %11 : vector<64x40xf32>
    %13 = arith.truncf %12 : vector<64x40xf32> to vector<64x40xbf16>
    %c0_6 = arith.constant 0 : index
    %c0_7 = arith.constant 0 : index
    %14 = vector.load %arg4[%c0_6, %c0_7] : memref<40x1536xbf16, #tpu.memory_space<vmem>>, vector<40x1536xbf16>
    %cst_8 = arith.constant dense<0.000000e+00> : vector<64x1536xf32>
    %15 = tpu.matmul %13, %14, %cst_8 {dimension_numbers = #tpu.dot_dimension_numbers<[1], [0], [0], [1], [0, 0, 1, 1], [], []>} : vector<64x40xbf16>, vector<40x1536xbf16>, vector<64x1536xf32> -> vector<64x1536xf32>
    %16 = arith.negf %15 : vector<64x1536xf32>
    %17 = math.exp %16 : vector<64x1536xf32>
    %cst_9 = arith.constant 1.000000e+00 : f32
    %18 = vector.broadcast %cst_9 : f32 to vector<64x1536xf32>
    %19 = arith.addf %18, %17 : vector<64x1536xf32>
    %20 = arith.divf %18, %19 : vector<64x1536xf32>
    %21 = arith.mulf %15, %20 : vector<64x1536xf32>
    %c0_10 = arith.constant 0 : index
    %c0_11 = arith.constant 0 : index
    %22 = vector.load %arg6[%c0_10, %c0_11] : memref<1x1536xf32, #tpu.memory_space<vmem>>, vector<1x1536xf32>
    %cst_12 = arith.constant dense<0.000000e+00> : vector<1536xf32>
    %23 = vector.multi_reduction <add>, %21, %cst_12 [0] : vector<64x1536xf32> to vector<1536xf32>
    %24 = vector.shape_cast %23 : vector<1536xf32> to vector<1x1536xf32>
    %25 = arith.addf %22, %24 : vector<1x1536xf32>
    %c0_13 = arith.constant 0 : index
    %c0_14 = arith.constant 0 : index
    %26 = vector.load %arg6[%c0_13, %c0_14] : memref<1x1536xf32, #tpu.memory_space<vmem>>, vector<1x1536xf32>
    tpu.vector_store %arg6[%c0_13, %c0_14], %25 {strides = array<i32>} : memref<1x1536xf32, #tpu.memory_space<vmem>>, vector<1x1536xf32>,
    %c0_i32_15 = arith.constant 0 : i32
    %27 = arith.cmpi eq, %arg1, %c0_i32_15 : i32
    %28 = arith.extui %27 : i1 to i32
    %c0_i32_16 = arith.constant 0 : i32
    %29 = arith.cmpi ne, %28, %c0_i32_16 : i32
    scf.if %29 {
      %c0_17 = arith.constant 0 : index
      %c0_18 = arith.constant 0 : index
      %30 = vector.load %arg6[%c0_17, %c0_18] : memref<1x1536xf32, #tpu.memory_space<vmem>>, vector<1x1536xf32>
      %cst_19 = arith.constant 1.562500e-02 : f32
      %31 = vector.broadcast %cst_19 : f32 to vector<1x1536xf32>
      %32 = arith.mulf %30, %31 : vector<1x1536xf32>
      %c0_20 = arith.constant 0 : index
      %c0_21 = arith.constant 0 : index
      %c0_22 = arith.constant 0 : index
      %33 = vector.load %arg5[%c0_20, %c0_21, %c0_22] : memref<1x1x1536xf32, #tpu.memory_space<vmem>>, vector<1x1x1536xf32>
      %34 = vector.shape_cast %33 : vector<1x1x1536xf32> to vector<1x1536xf32>
      %35 = vector.shape_cast %32 : vector<1x1536xf32> to vector<1x1x1536xf32>
      tpu.vector_store %arg5[%c0_20, %c0_21, %c0_22], %35 {strides = array<i32>} : memref<1x1x1536xf32, #tpu.memory_space<vmem>>, vector<1x1x1536xf32>,
    } else {
    }
    return
  }
  func.func @transform_0(%arg0: i32, %arg1: i32) -> (i32, i32, i32) {
    %c0_i32 = arith.constant 0 : i32
    %c0_i32_0 = arith.constant 0 : i32
    return %arg0, %arg1, %c0_i32 : i32, i32, i32
  }
  func.func @transform_1(%arg0: i32, %arg1: i32) -> (i32, i32) {
    %c0_i32 = arith.constant 0 : i32
    %c0_i32_0 = arith.constant 0 : i32
    %c0_i32_1 = arith.constant 0 : i32
    return %c0_i32, %c0_i32_0 : i32, i32
  }
  func.func @transform_2(%arg0: i32, %arg1: i32) -> (i32, i32) {
    %c0_i32 = arith.constant 0 : i32
    %c0_i32_0 = arith.constant 0 : i32
    %c0_i32_1 = arith.constant 0 : i32
    return %c0_i32, %c0_i32_0 : i32, i32
  }
  func.func @transform_3(%arg0: i32, %arg1: i32) -> (i32, i32, i32) {
    %c0_i32 = arith.constant 0 : i32
    %c0_i32_0 = arith.constant 0 : i32
    %c0_i32_1 = arith.constant 0 : i32
    return %arg0, %c0_i32, %c0_i32_0 : i32, i32, i32
  }
}

module attributes {stable_mosaic.version = 11 : i64} {
  func.func @_classifier_kernel(%arg0: i32, %arg1: memref<2x512xbf16, #tpu.memory_space<vmem>>, %arg2: memref<512x480xbf16, #tpu.memory_space<vmem>>, %arg3: memref<1x480xf32, #tpu.memory_space<vmem>>, %arg4: memref<480x5xbf16, #tpu.memory_space<vmem>>, %arg5: memref<1x5xf32, #tpu.memory_space<vmem>>, %arg6: memref<2x5xf32, #tpu.memory_space<vmem>>, %arg7: memref<2x480xf32, #tpu.memory_space<vmem>>) attributes {dimension_semantics = [#tpu.dimension_semantics<arbitrary>], iteration_bounds = array<i64: 3>, scalar_prefetch = 0 : i64, scratch_operands = 1 : i64, tpu.core_type = #tpu.core_type<tc>, window_params = [{transform_indices = @transform_0, window_bounds = array<i64: 2, 512>}, {transform_indices = @transform_1, window_bounds = array<i64: 512, 480>}, {pipeline_mode = #tpu.pipeline_mode<synchronous>, transform_indices = @transform_2, window_bounds = array<i64: 1, 480>}, {pipeline_mode = #tpu.pipeline_mode<synchronous>, transform_indices = @transform_3, window_bounds = array<i64: 480, 5>}, {pipeline_mode = #tpu.pipeline_mode<synchronous>, transform_indices = @transform_4, window_bounds = array<i64: 1, 5>}, {pipeline_mode = #tpu.pipeline_mode<synchronous>, transform_indices = @transform_5, window_bounds = array<i64: 2, 5>}]} {
    %c0_i32 = arith.constant 0 : i32
    %0 = arith.cmpi eq, %arg0, %c0_i32 : i32
    %1 = arith.extui %0 : i1 to i32
    %c0_i32_0 = arith.constant 0 : i32
    %2 = arith.cmpi ne, %1, %c0_i32_0 : i32
    scf.if %2 {
      %cst_9 = arith.constant 0.000000e+00 : f32
      %12 = vector.broadcast %cst_9 : f32 to vector<2x480xf32>
      %c0_10 = arith.constant 0 : index
      %c0_11 = arith.constant 0 : index
      %13 = vector.load %arg7[%c0_10, %c0_11] : memref<2x480xf32, #tpu.memory_space<vmem>>, vector<2x480xf32>
      tpu.vector_store %arg7[%c0_10, %c0_11], %12 {strides = array<i32>} : memref<2x480xf32, #tpu.memory_space<vmem>>, vector<2x480xf32>,
    } else {
    }
    %c0 = arith.constant 0 : index
    %c0_1 = arith.constant 0 : index
    %3 = vector.load %arg7[%c0, %c0_1] : memref<2x480xf32, #tpu.memory_space<vmem>>, vector<2x480xf32>
    %c0_2 = arith.constant 0 : index
    %c0_3 = arith.constant 0 : index
    %4 = vector.load %arg1[%c0_2, %c0_3] : memref<2x512xbf16, #tpu.memory_space<vmem>>, vector<2x512xbf16>
    %c0_4 = arith.constant 0 : index
    %c0_5 = arith.constant 0 : index
    %5 = vector.load %arg2[%c0_4, %c0_5] : memref<512x480xbf16, #tpu.memory_space<vmem>>, vector<512x480xbf16>
    %cst = arith.constant dense<0.000000e+00> : vector<2x480xf32>
    %6 = tpu.matmul %4, %5, %cst {dimension_numbers = #tpu.dot_dimension_numbers<[1], [0], [0], [1], [0, 0, 1, 1], [], []>} : vector<2x512xbf16>, vector<512x480xbf16>, vector<2x480xf32> -> vector<2x480xf32>
    %7 = arith.addf %3, %6 : vector<2x480xf32>
    %c0_6 = arith.constant 0 : index
    %c0_7 = arith.constant 0 : index
    %8 = vector.load %arg7[%c0_6, %c0_7] : memref<2x480xf32, #tpu.memory_space<vmem>>, vector<2x480xf32>
    tpu.vector_store %arg7[%c0_6, %c0_7], %7 {strides = array<i32>} : memref<2x480xf32, #tpu.memory_space<vmem>>, vector<2x480xf32>,
    %c2_i32 = arith.constant 2 : i32
    %9 = arith.cmpi eq, %arg0, %c2_i32 : i32
    %10 = arith.extui %9 : i1 to i32
    %c0_i32_8 = arith.constant 0 : i32
    %11 = arith.cmpi ne, %10, %c0_i32_8 : i32
    scf.if %11 {
      %c0_9 = arith.constant 0 : index
      %c0_10 = arith.constant 0 : index
      %12 = vector.load %arg7[%c0_9, %c0_10] : memref<2x480xf32, #tpu.memory_space<vmem>>, vector<2x480xf32>
      %c0_11 = arith.constant 0 : index
      %c0_12 = arith.constant 0 : index
      %13 = vector.load %arg3[%c0_11, %c0_12] : memref<1x480xf32, #tpu.memory_space<vmem>>, vector<1x480xf32>
      %14 = vector.broadcast %13 : vector<1x480xf32> to vector<2x480xf32>
      %15 = arith.addf %12, %14 : vector<2x480xf32>
      %cst_13 = arith.constant 0.000000e+00 : f32
      %16 = vector.broadcast %cst_13 : f32 to vector<2x480xf32>
      %17 = arith.maximumf %15, %16 : vector<2x480xf32>
      %18 = arith.truncf %17 : vector<2x480xf32> to vector<2x480xbf16>
      %c0_14 = arith.constant 0 : index
      %c0_15 = arith.constant 0 : index
      %19 = vector.load %arg4[%c0_14, %c0_15] : memref<480x5xbf16, #tpu.memory_space<vmem>>, vector<480x5xbf16>
      %cst_16 = arith.constant dense<0.000000e+00> : vector<2x5xf32>
      %20 = tpu.matmul %18, %19, %cst_16 {dimension_numbers = #tpu.dot_dimension_numbers<[1], [0], [0], [1], [0, 0, 1, 1], [], []>} : vector<2x480xbf16>, vector<480x5xbf16>, vector<2x5xf32> -> vector<2x5xf32>
      %c0_17 = arith.constant 0 : index
      %c0_18 = arith.constant 0 : index
      %21 = vector.load %arg5[%c0_17, %c0_18] : memref<1x5xf32, #tpu.memory_space<vmem>>, vector<1x5xf32>
      %22 = vector.broadcast %21 : vector<1x5xf32> to vector<2x5xf32>
      %23 = arith.addf %20, %22 : vector<2x5xf32>
      %c0_19 = arith.constant 0 : index
      %c0_20 = arith.constant 0 : index
      %24 = vector.load %arg6[%c0_19, %c0_20] : memref<2x5xf32, #tpu.memory_space<vmem>>, vector<2x5xf32>
      tpu.vector_store %arg6[%c0_19, %c0_20], %23 {strides = array<i32>} : memref<2x5xf32, #tpu.memory_space<vmem>>, vector<2x5xf32>,
    } else {
    }
    return
  }
  func.func @transform_0(%arg0: i32) -> (i32, i32) {
    %c0_i32 = arith.constant 0 : i32
    %c0_i32_0 = arith.constant 0 : i32
    return %c0_i32, %arg0 : i32, i32
  }
  func.func @transform_1(%arg0: i32) -> (i32, i32) {
    %c0_i32 = arith.constant 0 : i32
    %c0_i32_0 = arith.constant 0 : i32
    return %arg0, %c0_i32 : i32, i32
  }
  func.func @transform_2(%arg0: i32) -> (i32, i32) {
    %c0_i32 = arith.constant 0 : i32
    %c0_i32_0 = arith.constant 0 : i32
    %c0_i32_1 = arith.constant 0 : i32
    return %c0_i32, %c0_i32_0 : i32, i32
  }
  func.func @transform_3(%arg0: i32) -> (i32, i32) {
    %c0_i32 = arith.constant 0 : i32
    %c0_i32_0 = arith.constant 0 : i32
    %c0_i32_1 = arith.constant 0 : i32
    return %c0_i32, %c0_i32_0 : i32, i32
  }
  func.func @transform_4(%arg0: i32) -> (i32, i32) {
    %c0_i32 = arith.constant 0 : i32
    %c0_i32_0 = arith.constant 0 : i32
    %c0_i32_1 = arith.constant 0 : i32
    return %c0_i32, %c0_i32_0 : i32, i32
  }
  func.func @transform_5(%arg0: i32) -> (i32, i32) {
    %c0_i32 = arith.constant 0 : i32
    %c0_i32_0 = arith.constant 0 : i32
    %c0_i32_1 = arith.constant 0 : i32
    return %c0_i32, %c0_i32_0 : i32, i32
  }
}

</mosaic_0001>

<bundles_post_ra>
// kernel: forward.2
= control target key start
LH: loop header
LB: loop body
LE: loop exit
PB: predicated region body
PF: predicated region fallthrough
CT: control target
= control target key end

     0   :  { %8 = vsyncpa [#allocation4], 0  ;;  %s3738_s0 = inlined_call_operand.vmem [shape: bf16[2,64,27], index: 0, kind: input, shape index: {}]   ;;  %s3739_s1 = inlined_call_operand.hbm [shape: bf16[27,40], index: 1, kind: input, shape index: {}]   ;;  %s3740_s2 = inlined_call_operand.hbm [shape: bf16[40,1536], index: 2, kind: input, shape index: {}]   ;;  %s3741_s3 = inlined_call_operand.vmem [shape: f32[2,1,1536], index: 3, kind: output, shape index: {}]  }
   0x1   :  { %9 = vsyncpa [#allocation6], 0  ;;  %s2968_s12 = smov 0   ;;  %s2970_s13 = smov 0  }
   0x2   :  { %s2972_s14 = smov 0  }
   0x3 LB: > { %s2118_s15 = sadd.s32 4294967295, %s2936_s14   ;;  %s27_s16 = sadd.s32 1, %s2932_s13  ;;  %s2936_s14 = sphi %s2972_s14, %s15_s14   ;;  %s2932_s13 = sphi %s2970_s13, %s3848_s13   ;;  %s2928_s12 = sphi %s2968_s12, %s3847_s12  }
   0x4   : > { %p29_p0 = scmp.ge.s32.totalorder %s27_s16, 2  ;;  %p2120_p1 = scmp.ge.s32.totalorder %s2936_s14, 1 }
   0x5   : > { %p128_p2 = scmp.lt.s32.totalorder %s2936_s14, 3  ;;  %p2993_p4 = scmp.eq.s32.totalorder %s2118_s15, 0 }
   0x6   : > { %s3850_s16 = smov (%p29_p0, %s27_s16), 0  ;;  %s2938_s19 = smov [#allocation3]  }
   0x7   : > { %p2989_p3 = pnand %p2120_p1, %p128_p2  ;;  %s140_s20 = sshll.u32 %s2938_s19, 4  ;;  %s141_s20 = int_to_ptr.vmem [resolvable:$true] %s140_s20 }
   0x8   : > { %s2939_s22 = smov [#allocation5]   ;;  %s2865_s24 = scalar_lea.vmem %s141_s20, 256 }
   0x9   : > { %p2339_p5 = pneg %p2989_p3  ;;  %s153_s23 = sshll.u32 %s2939_s22, 4  ;;  %s154_s23 = int_to_ptr.vmem [resolvable:$true] %s153_s23 }
   0xa   : > { %p2866_p8 = scmp.ne.s32.totalorder %s141_s20, %s2865_s24  ;;  %p2873_p11 = scmp.lt.s32.totalorder %s141_s20, %s141_s20 }
   0xb   : > { %p3001_p6 = pnand %p2993_p4, %p2339_p5  ;;  %p2874_p12 = scmp.lt.s32.totalorder %s2865_s24, %s2865_s24 }
   0xd   : > { %p2856_p7 = pneg %p3001_p6  ;;  %p2875_p13 = por %p2874_p12, %p2873_p11 }
   0xf   : > { %p2868_p9 = pnand %p2866_p8, %p2856_p7 }
  0x11   : > { %p2869_p10 = pneg %p2868_p9 }
  0x13   : > { %p2876_p0 = pnand %p2875_p13, %p2869_p10 }
  0x15   : > { %2879 = shalt.err (!%p2876_p0)
}
  0x16   : > { %s2940_s25 = smov 64   ;;  %s2941_s26 = smov 4  }
  0x17   : > { %2342 = dma.hbm_to_vmem [thread:$0]  (!%p3001_p6), %s3739_s1, 256, %s141_s20, [#allocation4], %s2940_s25, %s2940_s25, %s2941_s26  }
  0x18   : > { %s2891_s29 = scalar_lea.vmem %s154_s23, 3840  ;;  %p2899_p8 = scmp.lt.s32.totalorder %s154_s23, %s154_s23 }
  0x19   : > { %p2892_p1 = scmp.ne.s32.totalorder %s154_s23, %s2891_s29  ;;  %p2900_p9 = scmp.lt.s32.totalorder %s2891_s29, %s2891_s29 }
  0x1b   : > { %p2894_p2 = pnand %p2892_p1, %p2856_p7  ;;  %p2901_p11 = por %p2900_p9, %p2899_p8 }
  0x1d   : > { %p2895_p5 = pneg %p2894_p2 }
  0x1f   : > { %p2902_p10 = pnand %p2901_p11, %p2895_p5 }
  0x21   : > { %2905 = shalt.err (!%p2902_p10)
}
  0x22   : > { %s2942_s30 = smov 768   ;;  %s2943_s4 = smov 48  }
  0x23   : > { %2345 = dma.hbm_to_vmem [thread:$0]  (!%p3001_p6), %s3740_s2, 3840, %s154_s23, [#allocation6], %s2942_s30, %s2942_s30, %s2943_s4  }
  0x24   : > { %182 = sbr.rel (%p2989_p3) target bundleno = 729 (0x2d9), region = 32 }
  0x29   : > { %2919 = dma.done.wait (%p2993_p4), [#allocation4], 256  }
  0x2a   : > { %2921 = vsyncadd (%p2993_p4), [#allocation4], 4294967040 }
  0x2b   : > { %2923 = dma.done.wait (%p2993_p4), [#allocation6], 3840  }
  0x2c   : > { %2925 = vsyncadd (%p2993_p4), [#allocation6], 4294963456  ;;  %vm294_vm0 = vcmask 1044480   ;;  %p214_p7 = scmp.lt.s32.totalorder %s2928_s12, 1  ;;  %vm295_vm1 = vcmask 1045504   ;;  %v2944_v0 = vmov 65535  }
  0x2d   : > { %v296_v1 = vsel %vm294_vm0, 4294967295, %v2944_v0  ;;  %v2384_v3 = vld [vmem:[#allocation3 + $0x8] sm:$0x3f]   ;;  %v2385_v4 = vld [vmem:[#allocation3] sm:$0xff]   ;;  %vm281_vm2 = vcmask 220160   ;;  %v451_v10 = vld [vmem:[#allocation5 + $0xc8] sm:$0xff] }
  0x2e   : > { %s3852_s12 = smov (!%p214_p7, %s2928_s12), 1  ;;  %v297_v2 = vsel %vm295_vm1, %v296_v1, 0  ;;  %v450_v11 = vld [vmem:[#allocation5 + $0xc0] sm:$0xff]  ;;  %v2174_v12 = vcombine.high %v451_v10, %v451_v10  ;;  %v2173_v13 = vcombine.low %v451_v10, %v451_v10  ;;  %vm619_vm3 = vcmask 1043456   ;;  %v2396_v18 = vld [vmem:[#allocation5 + $0x6c] ss:$48 sps:$4 sm:$0xff]  }
  0x2f   : > { %s2311_s7 = sshll.u32 %s3852_s12, 5  ;;  %v299_v5 = vand.u32 %v2384_v3, %v297_v2  ;;  %v2172_v14 = vcombine.high %v450_v11, %v450_v11  ;;  %v2171_v15 = vcombine.low %v450_v11, %v450_v11  ;;  %v2397_v19 = vld [vmem:[#allocation5 + $0x64] ss:$48 sps:$4 sm:$0xff]   ;;  %v2394_v20 = vld [vmem:[#allocation5 + $0x68] ss:$48 sps:$4 sm:$0xff]   ;;  %v2945_v26 = vmov 0  }
  0x30   : > { %s221_s10 = scalar_lea.vmem %s3738_s0, %s2311_s7  ;;  %v627_v16 = vsel %vm619_vm3, %v2173_v13, 0  ;;  %v2399_v21 = vld [vmem:[#allocation5 + $0x60] ss:$48 sps:$4 sm:$0xff]   ;;  %v2402_v22 = vld [vmem:[#allocation5 + $0xc] ss:$48 sps:$4 sm:$0xff]   ;;  %688 = vmatprep.mubr.bf16.mxu1 %v2945_v26  ;;  %vm606_vm4 = vcmask 326656  }
  0x31   : > { %v2386_v6 = vld [vmem:[%s221_s10] sm:$0xff]   ;;  %2318 = vmatprep.subr.bf16.mxu0 %v299_v5  ;;  %v2387_v7 = vld [vmem:[%s221_s10 + $0x8] sm:$0xff]   ;;  %v2388_v8 = vld [vmem:[%s221_s10 + $0x10] sm:$0xff]   ;;  %2183 = vmatprep.subr.msk.bf16.mxu1 %vm619_vm3, %v2172_v14  ;;  %v621_v17 = vsel %vm619_vm3, %v2171_v15, 0  ;;  %s2330_s11 = smul.u32 12, %s3852_s12 }
  0x32   : > { %2322 = vmatprep.mubr.msk.bf16.mxu0 %vm281_vm2, %v2386_v6  ;;  %2319 = vmatpush3.bf16.msra.mxu0 %v299_v5  ;;  %v2389_v9 = vld [vmem:[%s221_s10 + $0x18] sm:$0xff]   ;;  %v2403_v23 = vld [vmem:[#allocation5 + $0x4] ss:$48 sps:$4 sm:$0xff]   ;;  %v2400_v24 = vld [vmem:[#allocation5 + $0x8] ss:$48 sps:$4 sm:$0xff]  }
  0x33   : > { %2320 = vmatprep.subr.bf16.mxu0 %v2385_v4  ;;  %667 = vmatpush1.bf16.msra.mxu1 %v621_v17  ;;  %v2405_v25 = vld [vmem:[#allocation5] ss:$48 sps:$4 sm:$0xff]   ;;  %v453_v28 = vld [vmem:[#allocation5 + $0xd8] sm:$0xff]  ;;  %v2418_v15 = vld [vmem:[#allocation5 + $0x14] ss:$48 sps:$4 sm:$0xff]   ;;  %s3656_s17 = scalar_lea.vmem %s3741_s3, %s2330_s11 }
  0x34   : > { %668 = vmatprep.subr.bf16.mxu1 %v2397_v19  ;;  %v452_v27 = vld [vmem:[#allocation5 + $0xd0] sm:$0xff]  ;;  %v2178_v30 = vcombine.high %v453_v28, %v453_v28  ;;  %v2177_v62 = vcombine.low %v453_v28, %v453_v28  ;;  %v2413_v13 = vld [vmem:[#allocation5 + $0x78] ss:$48 sps:$4 sm:$0xff]  }
  0x35   : > { %v2176_v29 = vcombine.high %v452_v27, %v452_v27  ;;  %v2175_v61 = vcombine.low %v452_v27, %v452_v27  ;;  %v455_v19 = vld [vmem:[#allocation5 + $0xe8] sm:$0xff] }
  0x36   : > { %2321 = vmatpush3.bf16.msra.mxu0 %v2385_v4  ;;  %v639_v6 = vsel %vm619_vm3, %v2177_v62, 0 }
  0x37   : > { %2188 = vmatprep.subr.msk.bf16.mxu0 %vm619_vm3, %v2174_v12  ;;  %669 = vmatpush1.bf16.msra.mxu1 %v2399_v21  ;;  %v633_v5 = vsel %vm619_vm3, %v2175_v61, 0  ;;  %v2410_v12 = vld [vmem:[#allocation5 + $0x70] ss:$48 sps:$4 sm:$0xff]  }
  0x38   : > { %670 = vmatprep.subr.bf16.mxu1 %v2403_v23  ;;  %v2416_v21 = vld [vmem:[#allocation5 + $0x10] ss:$48 sps:$4 sm:$0xff]  }
  0x39   : > { %2323 = vmatmul.mubr.msk.bf16.vlgmr.msra.gmra.mxu0 %vm281_vm2, %v2387_v7 }
  0x3a   : > { %2326 = vmatprep.mubr.msk.bf16.mxu0 %vm281_vm2, %v2388_v8  ;;  %740 = vmatpush1.bf16.msra.mxu0 %v627_v16  ;;  %v2412_v8 = vld [vmem:[#allocation5 + $0x74] ss:$48 sps:$4 sm:$0xff]   ;;  %v2421_v16 = vld [vmem:[#allocation5 + $0x1c] ss:$48 sps:$4 sm:$0xff]  }
  0x3b   : > { %741 = vmatprep.subr.bf16.mxu0 %v2396_v18  ;;  %671 = vmatpush1.bf16.msra.mxu1 %v2405_v25  ;;  %v454_v18 = vld [vmem:[#allocation5 + $0xe0] sm:$0xff]  ;;  %v2182_v25 = vcombine.high %v455_v19, %v455_v19 }
  0x3c   : > { %2193 = vmatprep.subr.msk.bf16.mxu1 %vm619_vm3, %v2176_v29 }
  0x3e   : > { %742 = vmatpush1.bf16.msra.mxu0 %v2394_v20 }
  0x3f   : > { %743 = vmatprep.subr.bf16.mxu0 %v2402_v22  ;;  %v2419_v22 = vld [vmem:[#allocation5 + $0x18] ss:$48 sps:$4 sm:$0xff]  }
  0x41   : > { %2327 = vmatmul.mubr.msk.bf16.gmra.mxu0 %vm281_vm2, %v2389_v9  ;;  %v2415_v9 = vld [vmem:[#allocation5 + $0x7c] ss:$48 sps:$4 sm:$0xff]  }
  0x42   : > { %744 = vmatpush1.bf16.msra.mxu0 %v2400_v24  ;;  %761 = vmatprep.mubr.bf16.mxu0 %v2945_v26  ;;  %v2180_v24 = vcombine.high %v454_v18, %v454_v18 }
  0x43   : > { %2198 = vmatprep.subr.msk.bf16.mxu0 %vm619_vm3, %v2178_v30 }
  0xf9   : > { %v3049_v31 = vpop.f32.mrf.mxu0 }
  0xfa   : > { %v2141_v37 = vmul.f32 -1.442695, %v3049_v31 }
  0xfb   : > { %v335_v32 = vpop.f32.mrf.mxu0 }
  0xfc   : > { %v2139_v33 = vmul.f32 -1.442695, %v335_v32 }
  0xfd   : > { %v3051_v34 = vpop.f32.mrf.mxu0 }
  0xfe   : > { %2438 = vpow2.f32 %v2139_v33  ;;  %v2142_v35 = vmul.f32 -1.442695, %v3051_v34 }
  0xff   : > { %v338_v36 = vpop.f32.mrf.mxu0 }
 0x100   : > { %v2140_v38 = vmul.f32 -1.442695, %v338_v36  ;;  %2440 = vpow2.f32 %v2142_v35 }
 0x101   : > { %v3055_v39 = vpop.f32.mrf.mxu0 }
 0x102   : > { %2442 = vpow2.f32 %v2140_v38  ;;  %v2145_v51 = vmul.f32 -1.442695, %v3055_v39 }
 0x103   : > { %v3057_v40 = vpop.f32.mrf.mxu0  ;;  %2444 = vpow2.f32 %v2141_v37  ;;  %v2181_v37 = vcombine.low %v455_v19, %v455_v19 }
 0x104   : > { %v2143_v43 = vmul.f32 -1.442695, %v3057_v40 }
 0x105   : > { %v3059_v41 = vpop.f32.mrf.mxu0 }
 0x106   : > { %v2146_v47 = vmul.f32 -1.442695, %v3059_v41 }
 0x107   : > { %v3061_v42 = vpop.f32.mrf.mxu0 }
 0x108   : > { %v2144_v44 = vmul.f32 -1.442695, %v3061_v42 }
 0x10a   : > { %2446 = vpow2.f32 %v2144_v44  ;;  %v2434_v44 = vld [vmem:[#allocation5 + $0x24] ss:$48 sps:$4 sm:$0xff]  }
 0x10b   : > { %v2439_v45 = vpop.eup %2438  ;;  %2448 = vpow2.f32 %v2143_v43  ;;  %v2431_v43 = vld [vmem:[#allocation5 + $0x8c] ss:$48 sps:$4 sm:$0xff]  }
 0x10c   : > { %v390_v46 = vadd.f32 1.0, %v2439_v45  ;;  %v2437_v45 = vld [vmem:[#allocation5 + $0x2c] ss:$48 sps:$4 sm:$0xff]  }
 0x10d   : > { %v2441_v48 = vpop.eup %2440 }
 0x10e   : > { %2450 = vrcp.f32 %v390_v46  ;;  %v393_v53 = vadd.f32 1.0, %v2441_v48  ;;  %v2432_v46 = vld [vmem:[#allocation5 + $0x20] ss:$48 sps:$4 sm:$0xff]  }
 0x10f   : > { %v2443_v49 = vpop.eup %2442  ;;  %2452 = vpow2.f32 %v2146_v47  ;;  %v2435_v47 = vld [vmem:[#allocation5 + $0x28] ss:$48 sps:$4 sm:$0xff]  }
 0x110   : > { %v391_v50 = vadd.f32 1.0, %v2443_v49  ;;  %v2445_v52 = vpop.eup %2444 }
 0x111   : > { %v392_v54 = vadd.f32 1.0, %v2445_v52 }
 0x112   : > { %2454 = vrcp.f32 %v391_v50 }
 0x113   : > { %2456 = vpow2.f32 %v2145_v51 }
 0x114   : > { %2458 = vrcp.f32 %v393_v53 }
 0x115   : > { %2460 = vrcp.f32 %v392_v54 }
 0x117   : > { %v2447_v55 = vpop.eup %2446 }
 0x118   : > { %v2449_v56 = vpop.eup %2448  ;;  %v395_v57 = vadd.f32 1.0, %v2447_v55 }
 0x119   : > { %v394_v58 = vadd.f32 1.0, %v2449_v56 }
 0x11a   : > { %2462 = vrcp.f32 %v395_v57 }
 0x11b   : > { %v2451_v59 = vpop.eup %2450  ;;  %2464 = vrcp.f32 %v394_v58 }
 0x11c   : > { %v2453_v60 = vpop.eup %2452  ;;  %v414_v0 = vmul.f32 %v2451_v59, %v335_v32 }
 0x11d   : > { %v397_v4 = vadd.f32 1.0, %v2453_v60 }
 0x11f   : > { %v2455_v63 = vpop.eup %2454  ;;  %2466 = vrcp.f32 %v397_v4 }
 0x120   : > { %v415_v1 = vmul.f32 %v2455_v63, %v338_v36  ;;  %v2457_v2 = vpop.eup %2456  ;;  %v2179_v36 = vcombine.low %v454_v18, %v454_v18 }
 0x121   : > { %v2459_v7 = vpop.eup %2458  ;;  %v396_v10 = vadd.f32 1.0, %v2457_v2 }
 0x122   : > { %v3067_v3 = vpack.c.bf16 %v415_v1, %v414_v0  ;;  %v2461_v11 = vpop.eup %2460  ;;  %v417_v14 = vmul.f32 %v2459_v7, %v3051_v34  ;;  %v645_v38 = vsel %vm619_vm3, %v2179_v36, 0 }
 0x123   : > { %v416_v17 = vmul.f32 %v2461_v11, %v3049_v31  ;;  %2468 = vrcp.f32 %v396_v10 }
 0x124   : > { %2184 = vmatmul.mubr.msk.bf16.vlgmr.msra.gmra.mxu1 %vm606_vm4, %v3067_v3  ;;  %2189 = vmatmul.mubr.msk.bf16.vlgmr.msra.gmra.mxu0 %vm606_vm4, %v3067_v3 }
 0x125   : > { %813 = vmatpush1.bf16.msra.mxu1 %v633_v5  ;;  %886 = vmatpush1.bf16.msra.mxu0 %v639_v6  ;;  %v3079_v20 = vpack.c.bf16 %v417_v14, %v416_v17 }
 0x126   : > { %698 = vmatprep.mubr.bf16.mxu1 %v2945_v26  ;;  %771 = vmatprep.mubr.bf16.mxu0 %v2945_v26 }
 0x127   : > { %814 = vmatprep.subr.bf16.mxu1 %v2412_v8  ;;  %887 = vmatprep.subr.bf16.mxu0 %v2415_v9  ;;  %v2463_v23 = vpop.eup %2462 }
 0x128   : > { %v2465_v27 = vpop.eup %2464  ;;  %v419_v28 = vmul.f32 %v2463_v23, %v3061_v42  ;;  %v2428_v42 = vld [vmem:[#allocation5 + $0x84] ss:$48 sps:$4 sm:$0xff]  }
 0x129   : > { %815 = vmatpush1.bf16.msra.mxu1 %v2410_v12  ;;  %888 = vmatpush1.bf16.msra.mxu0 %v2413_v13  ;;  %v418_v29 = vmul.f32 %v2465_v27, %v3057_v40  ;;  %v651_v40 = vsel %vm619_vm3, %v2181_v37, 0 }
 0x12a   : > { %816 = vmatprep.subr.bf16.mxu1 %v2418_v15  ;;  %889 = vmatprep.subr.bf16.mxu0 %v2421_v16 }
 0x12b   : > { %v424_v30 = vpack.c.bf16 %v419_v28, %v418_v29 }
 0x12c   : > { %2185 = vmatmul.mubr.msk.bf16.gmra.mxu1 %vm606_vm4, %v3079_v20  ;;  %2190 = vmatmul.mubr.msk.bf16.gmra.mxu0 %vm606_vm4, %v3079_v20  ;;  %v2467_v31 = vpop.eup %2466 }
 0x12d   : > { %708 = vmatprep.mubr.bf16.mxu1 %v2945_v26  ;;  %781 = vmatprep.mubr.bf16.mxu0 %v2945_v26  ;;  %v421_v33 = vmul.f32 %v2467_v31, %v3059_v41  ;;  %v2429_v41 = vld [vmem:[#allocation5 + $0x88] ss:$48 sps:$4 sm:$0xff]  }
 0x12e   : > { %817 = vmatpush1.bf16.msra.mxu1 %v2416_v21  ;;  %890 = vmatpush1.bf16.msra.mxu0 %v2419_v22 }
 0x12f   : > { %2203 = vmatprep.subr.msk.bf16.mxu1 %vm619_vm3, %v2180_v24  ;;  %2208 = vmatprep.subr.msk.bf16.mxu0 %vm619_vm3, %v2182_v25 }
 0x130   : > { %v2469_v32 = vpop.eup %2468 }
 0x131   : > { %v420_v34 = vmul.f32 %v2469_v32, %v3055_v39  ;;  %v2426_v39 = vld [vmem:[#allocation5 + $0x80] ss:$48 sps:$4 sm:$0xff]  }
 0x133   : > { %v425_v35 = vpack.c.bf16 %v421_v33, %v420_v34 }
 0x134   : > { %2186 = vmatmul.mubr.msk.bf16.gmra.mxu1 %vm606_vm4, %v424_v30  ;;  %2191 = vmatmul.mubr.msk.bf16.gmra.mxu0 %vm606_vm4, %v424_v30 }
 0x135   : > { %718 = vmatprep.mubr.bf16.mxu1 %v2945_v26  ;;  %791 = vmatprep.mubr.bf16.mxu0 %v2945_v26 }
 0x13c   : > { %2187 = vmatmul.mubr.msk.bf16.gmra.mxu1 %vm606_vm4, %v425_v35  ;;  %2192 = vmatmul.mubr.msk.bf16.gmra.mxu0 %vm606_vm4, %v425_v35 }
 0x13d   : > { %834 = vmatprep.mubr.bf16.mxu1 %v2945_v26  ;;  %907 = vmatprep.mubr.bf16.mxu0 %v2945_v26 }
 0x144   : > { %2194 = vmatmul.mubr.msk.bf16.vlgmr.msra.gmra.mxu1 %vm606_vm4, %v3067_v3  ;;  %2199 = vmatmul.mubr.msk.bf16.vlgmr.msra.gmra.mxu0 %vm606_vm4, %v3067_v3 }
 0x145   : > { %959 = vmatpush1.bf16.msra.mxu1 %v645_v38  ;;  %1032 = vmatpush1.bf16.msra.mxu0 %v651_v40 }
 0x146   : > { %844 = vmatprep.mubr.bf16.mxu1 %v2945_v26  ;;  %917 = vmatprep.mubr.bf16.mxu0 %v2945_v26 }
 0x147   : > { %960 = vmatprep.subr.bf16.mxu1 %v2428_v42  ;;  %1033 = vmatprep.subr.bf16.mxu0 %v2431_v43 }
 0x149   : > { %961 = vmatpush1.bf16.msra.mxu1 %v2426_v39  ;;  %1034 = vmatpush1.bf16.msra.mxu0 %v2429_v41 }
 0x14a   : > { %962 = vmatprep.subr.bf16.mxu1 %v2434_v44  ;;  %1035 = vmatprep.subr.bf16.mxu0 %v2437_v45 }
 0x14c   : > { %2195 = vmatmul.mubr.msk.bf16.gmra.mxu1 %vm606_vm4, %v3079_v20  ;;  %2200 = vmatmul.mubr.msk.bf16.gmra.mxu0 %vm606_vm4, %v3079_v20 }
 0x14d   : > { %854 = vmatprep.mubr.bf16.mxu1 %v2945_v26  ;;  %927 = vmatprep.mubr.bf16.mxu0 %v2945_v26 }
 0x14e   : > { %963 = vmatpush1.bf16.msra.mxu1 %v2432_v46  ;;  %1036 = vmatpush1.bf16.msra.mxu0 %v2435_v47 }
 0x154   : > { %2196 = vmatmul.mubr.msk.bf16.gmra.mxu1 %vm606_vm4, %v424_v30  ;;  %2201 = vmatmul.mubr.msk.bf16.gmra.mxu0 %vm606_vm4, %v424_v30 }
 0x155   : > { %864 = vmatprep.mubr.bf16.mxu1 %v2945_v26  ;;  %937 = vmatprep.mubr.bf16.mxu0 %v2945_v26 }
 0x15c   : > { %2197 = vmatmul.mubr.msk.bf16.gmra.mxu1 %vm606_vm4, %v425_v35  ;;  %2202 = vmatmul.mubr.msk.bf16.gmra.mxu0 %vm606_vm4, %v425_v35 }
 0x15d   : > { %980 = vmatprep.mubr.bf16.mxu1 %v2945_v26  ;;  %1053 = vmatprep.mubr.bf16.mxu0 %v2945_v26 }
 0x164   : > { %2204 = vmatmul.mubr.msk.bf16.vlgmr.msra.gmra.mxu1 %vm606_vm4, %v3067_v3  ;;  %2209 = vmatmul.mubr.msk.bf16.vlgmr.msra.gmra.mxu0 %vm606_vm4, %v3067_v3 }
 0x165   : > { %990 = vmatprep.mubr.bf16.mxu1 %v2945_v26  ;;  %1063 = vmatprep.mubr.bf16.mxu0 %v2945_v26 }
 0x16c   : > { %2205 = vmatmul.mubr.msk.bf16.gmra.mxu1 %vm606_vm4, %v3079_v20  ;;  %2210 = vmatmul.mubr.msk.bf16.gmra.mxu0 %vm606_vm4, %v3079_v20 }
 0x16d   : > { %1000 = vmatprep.mubr.bf16.mxu1 %v2945_v26  ;;  %1073 = vmatprep.mubr.bf16.mxu0 %v2945_v26 }
 0x174   : > { %2206 = vmatmul.mubr.msk.bf16.gmra.mxu1 %vm606_vm4, %v424_v30  ;;  %2211 = vmatmul.mubr.msk.bf16.gmra.mxu0 %vm606_vm4, %v424_v30 }
 0x175   : > { %1010 = vmatprep.mubr.bf16.mxu1 %v2945_v26  ;;  %1083 = vmatprep.mubr.bf16.mxu0 %v2945_v26 }
 0x17c   : > { %2207 = vmatmul.mubr.msk.bf16.gmra.mxu1 %vm606_vm4, %v425_v35  ;;  %2212 = vmatmul.mubr.msk.bf16.gmra.mxu0 %vm606_vm4, %v425_v35 }
 0x1e4   : > { %v3141_v48 = vpop.f32.mrf.mxu1  ;;  %v3143_v49 = vpop.f32.mrf.mxu0 }
 0x1e5   : > { %v2213_v50 = vmul.f32 -1.442695, %v3141_v48  ;;  %v2215_v51 = vmul.f32 -1.442695, %v3143_v49 }
 0x1e6   : > { %v3147_v52 = vpop.f32.mrf.mxu1  ;;  %v3149_v53 = vpop.f32.mrf.mxu0 }
 0x1e7   : > { %2470 = vpow2.f32 %v2213_v50  ;;  %v2214_v54 = vmul.f32 -1.442695, %v3147_v52  ;;  %v2216_v26 = vmul.f32 -1.442695, %v3149_v53 }
 0x1e8   : > { %2472 = vpow2.f32 %v2215_v51  ;;  %v3153_v55 = vpop.f32.mrf.mxu1  ;;  %v3155_v56 = vpop.f32.mrf.mxu0 }
 0x1e9   : > { %2474 = vpow2.f32 %v2214_v54  ;;  %v2225_v57 = vmul.f32 -1.442695, %v3153_v55  ;;  %v2227_v58 = vmul.f32 -1.442695, %v3155_v56 }
 0x1ea   : > { %2476 = vpow2.f32 %v2216_v26  ;;  %v3159_v59 = vpop.f32.mrf.mxu1  ;;  %v3161_v60 = vpop.f32.mrf.mxu0 }
 0x1eb   : > { %2478 = vpow2.f32 %v2225_v57  ;;  %v2226_v61 = vmul.f32 -1.442695, %v3159_v59  ;;  %v2228_v62 = vmul.f32 -1.442695, %v3161_v60 }
 0x1ec   : > { %2480 = vpow2.f32 %v2227_v58  ;;  %v3165_v63 = vpop.f32.mrf.mxu1  ;;  %v3167_v0 = vpop.f32.mrf.mxu0 }
 0x1ed   : > { %2482 = vpow2.f32 %v2226_v61  ;;  %v2237_v1 = vmul.f32 -1.442695, %v3165_v63  ;;  %v2239_v2 = vmul.f32 -1.442695, %v3167_v0 }
 0x1ee   : > { %2484 = vpow2.f32 %v2228_v62  ;;  %v3171_v3 = vpop.f32.mrf.mxu1  ;;  %v3173_v4 = vpop.f32.mrf.mxu0 }
 0x1ef   : > { %2486 = vpow2.f32 %v2237_v1  ;;  %v2238_v5 = vmul.f32 -1.442695, %v3171_v3  ;;  %v2240_v6 = vmul.f32 -1.442695, %v3173_v4 }
 0x1f0   : > { %2488 = vpow2.f32 %v2239_v2  ;;  %v3177_v7 = vpop.f32.mrf.mxu1  ;;  %v3179_v8 = vpop.f32.mrf.mxu0 }
 0x1f1   : > { %2490 = vpow2.f32 %v2238_v5  ;;  %v2249_v9 = vmul.f32 -1.442695, %v3177_v7  ;;  %v2251_v10 = vmul.f32 -1.442695, %v3179_v8 }
 0x1f2   : > { %2492 = vpow2.f32 %v2240_v6  ;;  %v3183_v11 = vpop.f32.mrf.mxu1  ;;  %v3185_v12 = vpop.f32.mrf.mxu0 }
 0x1f3   : > { %2494 = vpow2.f32 %v2249_v9  ;;  %v2250_v13 = vmul.f32 -1.442695, %v3183_v11  ;;  %v2252_v14 = vmul.f32 -1.442695, %v3185_v12 }
 0x1f4   : > { %v2471_v15 = vpop.eup %2470  ;;  %2496 = vpow2.f32 %v2251_v10  ;;  %v3189_v16 = vpop.f32.mrf.mxu1 }
 0x1f5   : > { %v3191_v17 = vpop.f32.mrf.mxu0  ;;  %v2473_v18 = vpop.eup %2472  ;;  %v1382_v19 = vadd.f32 1.0, %v2471_v15  ;;  %2498 = vpow2.f32 %v2250_v13 }
 0x1f6   : > { %v2475_v20 = vpop.eup %2474  ;;  %v1384_v21 = vadd.f32 1.0, %v2473_v18  ;;  %2500 = vpow2.f32 %v2252_v14  ;;  %v3193_v22 = vpop.f32.mrf.mxu1  ;;  %v2261_v14 = vmul.f32 -1.442695, %v3189_v16 }
 0x1f7   : > { %v3195_v23 = vpop.f32.mrf.mxu0  ;;  %v2477_v24 = vpop.eup %2476  ;;  %2502 = vrcp.f32 %v1382_v19  ;;  %v1383_v25 = vadd.f32 1.0, %v2475_v20  ;;  %v2263_v19 = vmul.f32 -1.442695, %v3191_v17 }
 0x1f8   : > { %v2479_v27 = vpop.eup %2478  ;;  %2504 = vrcp.f32 %v1384_v21  ;;  %v1385_v28 = vadd.f32 1.0, %v2477_v24  ;;  %v3197_v29 = vpop.f32.mrf.mxu1 }
 0x1f9   : > { %v3199_v30 = vpop.f32.mrf.mxu0  ;;  %v2481_v31 = vpop.eup %2480  ;;  %2506 = vrcp.f32 %v1383_v25  ;;  %v1394_v32 = vadd.f32 1.0, %v2479_v27  ;;  %v2262_v25 = vmul.f32 -1.442695, %v3193_v22 }
 0x1fa   : > { %v2483_v33 = vpop.eup %2482  ;;  %2508 = vrcp.f32 %v1385_v28  ;;  %v1396_v34 = vadd.f32 1.0, %v2481_v31  ;;  %v3201_v35 = vpop.f32.mrf.mxu1  ;;  %v2264_v28 = vmul.f32 -1.442695, %v3195_v23 }
 0x1fb   : > { %v3203_v36 = vpop.f32.mrf.mxu0  ;;  %v2485_v37 = vpop.eup %2484  ;;  %2510 = vrcp.f32 %v1394_v32  ;;  %v1395_v38 = vadd.f32 1.0, %v2483_v33 }
 0x1fc   : > { %v2487_v40 = vpop.eup %2486  ;;  %2512 = vrcp.f32 %v1396_v34  ;;  %v1397_v42 = vadd.f32 1.0, %v2485_v37  ;;  %v3205_v43 = vpop.f32.mrf.mxu1  ;;  %v2273_v34 = vmul.f32 -1.442695, %v3197_v29 }
 0x1fd   : > { %v3207_v39 = vpop.f32.mrf.mxu0  ;;  %v2489_v41 = vpop.eup %2488  ;;  %2514 = vrcp.f32 %v1395_v38  ;;  %v1406_v44 = vadd.f32 1.0, %v2487_v40  ;;  %v2275_v38 = vmul.f32 -1.442695, %v3199_v30  ;;  %v2274_v40 = vmul.f32 -1.442695, %v3201_v35 }
 0x1fe   : > { %v2491_v45 = vpop.eup %2490  ;;  %2516 = vrcp.f32 %v1397_v42  ;;  %v1408_v46 = vadd.f32 1.0, %v2489_v41  ;;  %v3209_v47 = vpop.f32.mrf.mxu1  ;;  %v2276_v42 = vmul.f32 -1.442695, %v3203_v36 }
 0x1ff   : > { %v3211_v50 = vpop.f32.mrf.mxu0  ;;  %v2493_v51 = vpop.eup %2492  ;;  %2518 = vrcp.f32 %v1406_v44  ;;  %v1407_v54 = vadd.f32 1.0, %v2491_v45 }
 0x200   : > { %v2495_v26 = vpop.eup %2494  ;;  %2520 = vrcp.f32 %v1408_v46  ;;  %v1409_v57 = vadd.f32 1.0, %v2493_v51  ;;  %v3213_v58 = vpop.f32.mrf.mxu1 }
 0x201   : > { %v3215_v61 = vpop.f32.mrf.mxu0  ;;  %v2497_v62 = vpop.eup %2496  ;;  %2522 = vrcp.f32 %v1407_v54  ;;  %v1418_v1 = vadd.f32 1.0, %v2495_v26  ;;  %v2285_v54 = vmul.f32 -1.442695, %v3205_v43 }
 0x202   : > { %v2499_v2 = vpop.eup %2498  ;;  %2524 = vrcp.f32 %v1409_v57  ;;  %v1420_v5 = vadd.f32 1.0, %v2497_v62  ;;  %v3217_v6 = vpop.f32.mrf.mxu1 }
 0x203   : > { %v3219_v9 = vpop.f32.mrf.mxu0  ;;  %v2501_v10 = vpop.eup %2500  ;;  %2526 = vrcp.f32 %v1418_v1  ;;  %v1419_v13 = vadd.f32 1.0, %v2499_v2  ;;  %v2287_v1 = vmul.f32 -1.442695, %v3207_v39 }
 0x204   : > { %v2503_v15 = vpop.eup %2502  ;;  %2528 = vrcp.f32 %v1420_v5  ;;  %v1421_v18 = vadd.f32 1.0, %v2501_v10  ;;  %v3223_v20 = vpop.f32.mrf.mxu1 }
 0x205   : > { %v3225_v21 = vpop.f32.mrf.mxu0  ;;  %v2505_v24 = vpop.eup %2504  ;;  %2530 = vrcp.f32 %v1419_v13  ;;  %v1670_v46 = vmul.f32 %v2503_v15, %v3141_v48 }
 0x206   : > { %v2507_v27 = vpop.eup %2506  ;;  %2532 = vrcp.f32 %v1421_v18  ;;  %v3229_v31 = vpop.f32.mrf.mxu1  ;;  %v1672_v57 = vmul.f32 %v2505_v24, %v3143_v49 }
 0x207   : > { %v3231_v32 = vpop.f32.mrf.mxu0  ;;  %v2509_v33 = vpop.eup %2508  ;;  %2534 = vpow2.f32 %v2261_v14  ;;  %v1671_v5 = vmul.f32 %v2507_v27, %v3147_v52  ;;  %v2286_v52 = vmul.f32 -1.442695, %v3209_v47 }
 0x208   : > { %v2511_v37 = vpop.eup %2510  ;;  %2536 = vpow2.f32 %v2263_v19  ;;  %v3237_v41 = vpop.f32.mrf.mxu1 }
 0x209   : > { %v3239_v44 = vpop.f32.mrf.mxu0  ;;  %v2513_v45 = vpop.eup %2512  ;;  %v1682_v51 = vmul.f32 %v2511_v37, %v3153_v55  ;;  %2538 = vpow2.f32 %v2262_v25  ;;  %v1673_v55 = vmul.f32 %v2509_v33, %v3149_v53  ;;  %v2288_v53 = vmul.f32 -1.442695, %v3211_v50 }
 0x20a   : > { %v2515_v26 = vpop.eup %2514  ;;  %v1684_v62 = vmul.f32 %v2513_v45, %v3155_v56  ;;  %2540 = vpow2.f32 %v2264_v28  ;;  %v3251_v49 = vpop.f32.mrf.mxu1 }
 0x20b   : > { %v2517_v2 = vpop.eup %2516  ;;  %v1768_v10 = vadd.f32 %v1682_v51, %v1670_v46  ;;  %v1683_v13 = vmul.f32 %v2515_v26, %v3159_v59  ;;  %2542 = vpow2.f32 %v2273_v34  ;;  %v3253_v56 = vpop.f32.mrf.mxu0  ;;  %v2297_v34 = vmul.f32 -1.442695, %v3213_v58 }
 0x20c   : > { %v2519_v48 = vpop.eup %2518  ;;  %v1794_v14 = vadd.f32 %v1684_v62, %v1672_v57  ;;  %v1685_v15 = vmul.f32 %v2517_v2, %v3161_v60  ;;  %2544 = vpow2.f32 %v2275_v38  ;;  %v3263_v45 = vpop.f32.mrf.mxu1 }
 0x20d   : > { %v2521_v18 = vpop.eup %2520  ;;  %v1781_v19 = vadd.f32 %v1683_v13, %v1671_v5  ;;  %v1694_v24 = vmul.f32 %v2519_v48, %v3165_v63  ;;  %2546 = vpow2.f32 %v2274_v40  ;;  %v2299_v40 = vmul.f32 -1.442695, %v3215_v61 }
 0x20e   : > { %v2523_v59 = vpop.eup %2522  ;;  %v1807_v25 = vadd.f32 %v1685_v15, %v1673_v55  ;;  %v1696_v27 = vmul.f32 %v2521_v18, %v3167_v0  ;;  %2548 = vpow2.f32 %v2276_v42  ;;  %v3265_v0 = vpop.f32.mrf.mxu0 }
 0x20f   : > { %v2525_v60 = vpop.eup %2524  ;;  %v1769_v28 = vadd.f32 %v1768_v10, %v1694_v24  ;;  %v1695_v33 = vmul.f32 %v2523_v59, %v3171_v3  ;;  %2550 = vpow2.f32 %v2285_v54  ;;  %v2298_v3 = vmul.f32 -1.442695, %v3217_v6  ;;  %v3277_v13 = vpop.f32.mrf.mxu1 }
 0x210   : > { %v2527_v37 = vpop.eup %2526  ;;  %v1795_v38 = vadd.f32 %v1794_v14, %v1696_v27  ;;  %v1697_v63 = vmul.f32 %v2525_v60, %v3173_v4  ;;  %2552 = vpow2.f32 %v2287_v1  ;;  %v2300_v4 = vmul.f32 -1.442695, %v3219_v9  ;;  %v3279_v48 = vpop.f32.mrf.mxu0 }
 0x211   : > { %v2529_v42 = vpop.eup %2528  ;;  %v1782_v46 = vadd.f32 %v1781_v19, %v1695_v33  ;;  %v1706_v51 = vmul.f32 %v2527_v37, %v3177_v7  ;;  %2554 = vpow2.f32 %v2286_v52  ;;  %v3285_v59 = vpop.f32.mrf.mxu1 }
 0x212   : > { %v2531_v54 = vpop.eup %2530  ;;  %v1808_v26 = vadd.f32 %v1807_v25, %v1697_v63  ;;  %v1708_v57 = vmul.f32 %v2529_v42, %v3179_v8  ;;  %2556 = vpow2.f32 %v2288_v53  ;;  %v3287_v25 = vpop.f32.mrf.mxu0 }
 0x213   : > { %v2533_v62 = vpop.eup %2532  ;;  %v3271_v1 = vadd.f32 %v1769_v28, %v1706_v51  ;;  %v1707_v2 = vmul.f32 %v2531_v54, %v3183_v11  ;;  %2558 = vpow2.f32 %v2297_v34  ;;  %v3289_v63 = vpop.f32.mrf.mxu1 }
 0x214   : > { %v2535_v5 = vpop.eup %2534  ;;  %v3274_v10 = vadd.f32 %v1795_v38, %v1708_v57  ;;  %v1709_v7 = vmul.f32 %v2533_v62, %v3185_v12  ;;  %2560 = vpow2.f32 %v2299_v40  ;;  %v3291_v40 = vpop.f32.mrf.mxu0 }
 0x215   : > { %v2537_v8 = vpop.eup %2536  ;;  %v3281_v55 = vadd.f32 %v1782_v46, %v1707_v2  ;;  %v1430_v14 = vadd.f32 1.0, %v2535_v5  ;;  %2562 = vpow2.f32 %v2298_v3  ;;  %v3293_v62 = vpop.f32.mrf.mxu1 }
 0x216   : > { %v2539_v15 = vpop.eup %2538  ;;  %v3283_v18 = vadd.f32 %v1808_v26, %v1709_v7  ;;  %v1432_v11 = vadd.f32 1.0, %v2537_v8  ;;  %2564 = vpow2.f32 %v2300_v4  ;;  %v3295_v2 = vpop.f32.mrf.mxu0 }
 0x217   : > { %v2541_v19 = vpop.eup %2540  ;;  %2566 = vrcp.f32 %v1430_v14  ;;  %v1431_v24 = vadd.f32 1.0, %v2539_v15 }
 0x218   : > { %v2543_v52 = vpop.eup %2542  ;;  %2568 = vrcp.f32 %v1432_v11  ;;  %v1433_v12 = vadd.f32 1.0, %v2541_v19  ;;  %v2217_v19 = vmul.f32 -1.442695, %v3223_v20 }
 0x219   : > { %v2545_v27 = vpop.eup %2544  ;;  %2570 = vrcp.f32 %v1431_v24  ;;  %v1442_v53 = vadd.f32 1.0, %v2543_v52 }
 0x21a   : > { %v2547_v60 = vpop.eup %2546  ;;  %2572 = vrcp.f32 %v1433_v12  ;;  %v1444_v28 = vadd.f32 1.0, %v2545_v27  ;;  %v2219_v12 = vmul.f32 -1.442695, %v3225_v21  ;;  %v3299_v27 = vpop.f32.mrf.mxu1 }
 0x21b   : > { %v2549_v33 = vpop.eup %2548  ;;  %2574 = vrcp.f32 %v1442_v53  ;;  %v1443_v34 = vadd.f32 1.0, %v2547_v60  ;;  %v3301_v53 = vpop.f32.mrf.mxu0 }
 0x21c   : > { %v2551_v37 = vpop.eup %2550  ;;  %2576 = vrcp.f32 %v1444_v28  ;;  %v1445_v38 = vadd.f32 1.0, %v2549_v33  ;;  %v233_v33 = vlaneseq }
 0x21d   : > { %v2553_v42 = vpop.eup %2552  ;;  %2578 = vrcp.f32 %v1443_v34  ;;  %v1454_v46 = vadd.f32 1.0, %v2551_v37  ;;  %v2218_v34 = vmul.f32 -1.442695, %v3229_v31 }
 0x21e   : > { %v2555_v51 = vpop.eup %2554  ;;  %2580 = vrcp.f32 %v1445_v38  ;;  %v1456_v3 = vadd.f32 1.0, %v2553_v42  ;;  %v2946_v42 = vmov 1966171168   ;;  %vm3431_vm5 = vcmp.lt.s32.totalorder %v233_v33, 512 }
 0x21f   : > { %v2557_v54 = vpop.eup %2556  ;;  %2582 = vrcp.f32 %v1454_v46  ;;  %v1455_v26 = vadd.f32 1.0, %v2555_v51  ;;  %v3306_v46 = vunpack.c.l.s4 %v2946_v42  ;;  %v2220_v51 = vmul.f32 -1.442695, %v3231_v32 }
 0x220   : > { %v2559_v57 = vpop.eup %2558  ;;  %2584 = vrcp.f32 %v1456_v3  ;;  %v1457_v4 = vadd.f32 1.0, %v2557_v54 }
 0x221   : > { %v2561_v5 = vpop.eup %2560  ;;  %2586 = vrcp.f32 %v1455_v26  ;;  %v1466_v7 = vadd.f32 1.0, %v2559_v57 }
 0x222   : > { %v2563_v8 = vpop.eup %2562  ;;  %2588 = vrcp.f32 %v1457_v4  ;;  %v1468_v14 = vadd.f32 1.0, %v2561_v5 }
 0x223   : > { %v2565_v15 = vpop.eup %2564  ;;  %2590 = vrcp.f32 %v1466_v7  ;;  %v1467_v11 = vadd.f32 1.0, %v2563_v8  ;;  %v3315_v7 = vpop.f32.mrf.mxu1 }
 0x224   : > { %v2567_v24 = vpop.eup %2566  ;;  %2592 = vrcp.f32 %v1468_v14  ;;  %v1469_v52 = vadd.f32 1.0, %v2565_v15  ;;  %v3317_v8 = vpop.f32.mrf.mxu0  ;;  %v2230_v15 = vmul.f32 -1.442695, %v3251_v49 }
 0x225   : > { %v2569_v60 = vpop.eup %2568  ;;  %v1718_v28 = vmul.f32 %v2567_v24, %v3189_v16  ;;  %2594 = vrcp.f32 %v1467_v11  ;;  %v2229_v16 = vmul.f32 -1.442695, %v3237_v41  ;;  %3778 = vst [vmem:[#allocation9_spill] sm:$0xff] %v3317_v8 }
 0x226   : > { %v2571_v37 = vpop.eup %2570  ;;  %v1720_v38 = vmul.f32 %v2569_v60, %v3191_v17  ;;  %2596 = vrcp.f32 %v1469_v52  ;;  %v2231_v17 = vmul.f32 -1.442695, %v3239_v44 }
 0x227   : > { %v2573_v3 = vpop.eup %2572  ;;  %v1771_v54 = vadd.f32 %v3271_v1, %v1718_v28  ;;  %v1719_v26 = vmul.f32 %v2571_v37, %v3193_v22  ;;  %2598 = vpow2.f32 %v2217_v19  ;;  %v2232_v19 = vmul.f32 -1.442695, %v3253_v56 }
 0x228   : > { %v2575_v57 = vpop.eup %2574  ;;  %v1797_v4 = vadd.f32 %v3274_v10, %v1720_v38  ;;  %v1721_v5 = vmul.f32 %v2573_v3, %v3195_v23  ;;  %2600 = vpow2.f32 %v2219_v12 }
 0x229   : > { %v2577_v14 = vpop.eup %2576  ;;  %v1784_v1 = vadd.f32 %v3281_v55, %v1719_v26  ;;  %v1730_v22 = vmul.f32 %v2575_v57, %v3197_v29  ;;  %2602 = vpow2.f32 %v2218_v34  ;;  %v2241_v55 = vmul.f32 -1.442695, %v3263_v45 }
 0x22a   : > { %v2579_v11 = vpop.eup %2578  ;;  %v1810_v10 = vadd.f32 %v3283_v18, %v1721_v5  ;;  %v1732_v23 = vmul.f32 %v2577_v14, %v3199_v30  ;;  %2604 = vpow2.f32 %v2220_v51  ;;  %v2243_v34 = vmul.f32 -1.442695, %v3265_v0  ;;  %v3329_v18 = vpop.f32.mrf.mxu1 }
 0x22b   : > { %v2581_v24 = vpop.eup %2580  ;;  %v1772_v52 = vadd.f32 %v1771_v54, %v1730_v22  ;;  %v1731_v12 = vmul.f32 %v2579_v11, %v3201_v35  ;;  %2606 = vpow2.f32 %v2229_v16  ;;  %3779 = vst [vmem:[#allocation10_spill] sm:$0xff] %v3329_v18  ;;  %v3331_v30 = vpop.f32.mrf.mxu0  ;;  %v2242_v35 = vmul.f32 -1.442695, %v3277_v13 }
 0x22c   : > { %v2583_v60 = vpop.eup %2582  ;;  %v1798_v29 = vadd.f32 %v1797_v4, %v1732_v23  ;;  %v1733_v28 = vmul.f32 %v2581_v24, %v3203_v36  ;;  %2608 = vpow2.f32 %v2231_v17  ;;  %3780 = vst [vmem:[#allocation11_spill] sm:$0xff] %v3331_v30  ;;  %v2244_v36 = vmul.f32 -1.442695, %v3279_v48 }
 0x22d   : > { %v2585_v37 = vpop.eup %2584  ;;  %v1785_v38 = vadd.f32 %v1784_v1, %v1731_v12  ;;  %v1742_v42 = vmul.f32 %v2583_v60, %v3205_v43  ;;  %2610 = vpow2.f32 %v2230_v15  ;;  %v2253_v4 = vmul.f32 -1.442695, %v3285_v59  ;;  %v3341_v1 = vpop.f32.mrf.mxu1 }
 0x22e   : > { %v2587_v51 = vpop.eup %2586  ;;  %v1811_v3 = vadd.f32 %v1810_v10, %v1733_v28  ;;  %v1744_v54 = vmul.f32 %v2585_v37, %v3207_v39  ;;  %2612 = vpow2.f32 %v2232_v19  ;;  %v2255_v14 = vmul.f32 -1.442695, %v3287_v25  ;;  %3781 = vst [vmem:[#allocation12_spill] sm:$0xff] %v3341_v1  ;;  %v3343_v39 = vpop.f32.mrf.mxu0 }
 0x22f   : > { %v2589_v26 = vpop.eup %2588  ;;  %v1773_v16 = vadd.f32 %v1772_v52, %v1742_v42  ;;  %v1743_v57 = vmul.f32 %v2587_v51, %v3209_v47  ;;  %2614 = vpow2.f32 %v2241_v55  ;;  %3782 = vst [vmem:[#allocation13_spill] sm:$0xff] %v3343_v39  ;;  %v2254_v47 = vmul.f32 -1.442695, %v3289_v63 }
 0x230   : > { %v2591_v5 = vpop.eup %2590  ;;  %v1799_v17 = vadd.f32 %v1798_v29, %v1744_v54  ;;  %v1745_v43 = vmul.f32 %v2589_v26, %v3211_v50  ;;  %2616 = vpow2.f32 %v2243_v34  ;;  %v2256_v50 = vmul.f32 -1.442695, %v3291_v40  ;;  %v3355_v34 = vpop.f32.mrf.mxu1 }
 0x231   : > { %v2593_v22 = vpop.eup %2592  ;;  %v1786_v15 = vadd.f32 %v1785_v38, %v1743_v57  ;;  %v1754_v11 = vmul.f32 %v2591_v5, %v3213_v58  ;;  %2618 = vpow2.f32 %v2242_v35  ;;  %v1942_v55 = vunpack.c.0.s8 %v3306_v46  ;;  %3783 = vst [vmem:[#allocation14_spill] sm:$0xff] %v3355_v34 }
 0x232   : > { %v2595_v10 = vpop.eup %2594  ;;  %v1812_v23 = vadd.f32 %v1811_v3, %v1745_v43  ;;  %v1756_v19 = vmul.f32 %v2593_v22, %v3215_v61  ;;  %2620 = vpow2.f32 %v2244_v36  ;;  %v3352_v58 = vshrl.u32 %v233_v33, 7  ;;  %v3357_v61 = vpop.f32.mrf.mxu0 }
 0x233   : > { %v2597_v24 = vpop.eup %2596  ;;  %v1774_v52 = vadd.f32 %v1773_v16, %v1754_v11  ;;  %v1755_v12 = vmul.f32 %v2595_v10, %v3217_v6  ;;  %2622 = vpow2.f32 %v2253_v4  ;;  %3784 = vst [vmem:[#allocation15_spill] sm:$0xff] %v3357_v61  ;;  %v3359_v43 = vpop.f32.mrf.mxu1 }
 0x234   : > { %v2599_v60 = vpop.eup %2598  ;;  %v1800_v29 = vadd.f32 %v1799_v17, %v1756_v19  ;;  %v1757_v28 = vmul.f32 %v2597_v24, %v3219_v9  ;;  %2624 = vpow2.f32 %v2255_v14  ;;  %3785 = vst [vmem:[#allocation16_spill] sm:$0xff] %v3359_v43  ;;  %v3361_v14 = vpop.f32.mrf.mxu0 }
 0x235   : > { %v2601_v37 = vpop.eup %2600  ;;  %v1775_v38 = vrot.slane %v1774_v52, 4  ;;  %v1787_v42 = vadd.f32 %v1786_v15, %v1755_v12  ;;  %v1386_v35 = vadd.f32 1.0, %v2599_v60  ;;  %2626 = vpow2.f32 %v2254_v47  ;;  %3786 = vst [vmem:[#allocation17_spill] sm:$0xff] %v3361_v14 }
 0x236   : > { %v2603_v6 = vpop.eup %2602  ;;  %v1801_v51 = vrot.slane %v1800_v29, 4  ;;  %v1813_v3 = vadd.f32 %v1812_v23, %v1757_v28  ;;  %v1388_v54 = vadd.f32 1.0, %v2601_v37  ;;  %2628 = vpow2.f32 %v2256_v50 }
 0x237   : > { %v2605_v36 = vpop.eup %2604  ;;  %v1776_v26 = vadd.f32 %v1775_v38, %v1774_v52  ;;  %v1788_v16 = vrot.slane %v1787_v42, 4  ;;  %2630 = vrcp.f32 %v1386_v35  ;;  %v1387_v9 = vadd.f32 1.0, %v2603_v6  ;;  %v3363_v35 = vpop.f32.mrf.mxu1 }
 0x238   : > { %v2607_v57 = vpop.eup %2606  ;;  %v1802_v4 = vadd.f32 %v1801_v51, %v1800_v29  ;;  %v1814_v5 = vrot.slane %v1813_v3, 4  ;;  %2632 = vrcp.f32 %v1388_v54  ;;  %v1389_v17 = vadd.f32 1.0, %v2605_v36  ;;  %3787 = vst [vmem:[#allocation18_spill] sm:$0xff] %v3363_v35 }
 0x239   : > { %v2609_v22 = vpop.eup %2608  ;;  %v1777_v15 = vrot.slane %v1776_v26, 2  ;;  %v1789_v11 = vadd.f32 %v1788_v16, %v1787_v42  ;;  %2634 = vrcp.f32 %v1387_v9  ;;  %v1398_v47 = vadd.f32 1.0, %v2607_v57  ;;  %v3365_v42 = vpop.f32.mrf.mxu0 }
 0x23a   : > { %v2611_v10 = vpop.eup %2610  ;;  %v1803_v23 = vrot.slane %v1802_v4, 2  ;;  %v1815_v19 = vadd.f32 %v1814_v5, %v1813_v3  ;;  %2636 = vrcp.f32 %v1389_v17  ;;  %v1400_v50 = vadd.f32 1.0, %v2609_v22  ;;  %3788 = vst [vmem:[#allocation19_spill] sm:$0xff] %v3365_v42 }
 0x23b   : > { %v2613_v24 = vpop.eup %2612  ;;  %v1778_v52 = vadd.f32 %v1777_v15, %v1776_v26  ;;  %v1790_v12 = vrot.slane %v1789_v11, 2  ;;  %2638 = vrcp.f32 %v1398_v47  ;;  %v1399_v60 = vadd.f32 1.0, %v2611_v10  ;;  %v3372_v47 = vpop.f32.mrf.mxu1 }
 0x23c   : > { %v2615_v29 = vpop.eup %2614  ;;  %v1804_v28 = vadd.f32 %v1803_v23, %v1802_v4  ;;  %v1816_v37 = vrot.slane %v1815_v19, 2  ;;  %2640 = vrcp.f32 %v1400_v50  ;;  %v1401_v38 = vadd.f32 1.0, %v2613_v24  ;;  %3790 = vst [vmem:[#allocation21_spill] sm:$0xff] %v3372_v47  ;;  %v3374_v10 = vpop.f32.mrf.mxu0 }
 0x23d   : > { %v2617_v6 = vpop.eup %2616  ;;  %v1779_v51 = vrot.slane %v1778_v52, 1  ;;  %v1791_v54 = vadd.f32 %v1790_v12, %v1789_v11  ;;  %2642 = vrcp.f32 %v1399_v60  ;;  %v1410_v3 = vadd.f32 1.0, %v2615_v29  ;;  %3791 = vst [vmem:[#allocation22_spill] sm:$0xff] %v3374_v10 }
 0x23e   : > { %v2619_v36 = vpop.eup %2618  ;;  %v1805_v16 = vrot.slane %v1804_v28, 1  ;;  %v1817_v26 = vadd.f32 %v1816_v37, %v1815_v19  ;;  %2644 = vrcp.f32 %v1401_v38  ;;  %v1412_v9 = vadd.f32 1.0, %v2617_v6 }
 0x23f   : > { %v2621_v57 = vpop.eup %2620  ;;  %v1792_v5 = vrot.slane %v1791_v54, 1  ;;  %2646 = vrcp.f32 %v1410_v3  ;;  %v1411_v4 = vadd.f32 1.0, %v2619_v36  ;;  %v3370_v22 = vsub.s32 %v1942_v55, %v3352_v58 }
 0x240   : > { %v2623_v17 = vpop.eup %2622  ;;  %v1818_v15 = vrot.slane %v1817_v26, 1  ;;  %2648 = vrcp.f32 %v1412_v9  ;;  %v1413_v11 = vadd.f32 1.0, %v2621_v57  ;;  %v1780_v19 = vadd.f32 %v1779_v51, %v1778_v52  ;;  %v3380_v51 = vpop.f32.mrf.mxu1 }
 0x241   : > { %3789 = vst [vmem:[#allocation20_spill] sm:$0xff] %v3370_v22  ;;  %v2625_v23 = vpop.eup %2624  ;;  %v1793_v50 = vadd.f32 %v1792_v5, %v1791_v54  ;;  %2650 = vrcp.f32 %v1411_v4  ;;  %v1422_v24 = vadd.f32 1.0, %v2623_v17  ;;  %v1806_v60 = vadd.f32 %v1805_v16, %v1804_v28  ;;  %3792 = vst [vmem:[#allocation23_spill] sm:$0xff] %v3380_v51  ;;  %v3382_v54 = vpop.f32.mrf.mxu0 }
 0x242   : > { %v2627_v12 = vpop.eup %2626  ;;  %v1819_v29 = vadd.f32 %v1818_v15, %v1817_v26  ;;  %2652 = vrcp.f32 %v1413_v11  ;;  %v1424_v37 = vadd.f32 1.0, %v2625_v23  ;;  %v2265_v38 = vmul.f32 -1.442695, %v3293_v62  ;;  %3793 = vst [vmem:[#allocation24_spill] sm:$0xff] %v3382_v54 }
 0x243   : > { %v2629_v46 = vpop.eup %2628  ;;  %v1936_v55 = vcombine.low %v1780_v19, %v1793_v50  ;;  %2654 = vrcp.f32 %v1422_v24  ;;  %v1423_v58 = vadd.f32 1.0, %v2627_v12  ;;  %v2267_v52 = vmul.f32 -1.442695, %v3295_v2  ;;  %v3404_v19 = vpop.f32.mrf.mxu1 }
 0x244   : > { %v3377_v6 = vpop.eup %2630  ;;  %v1937_v3 = vcombine.low %v1806_v60, %v1819_v29  ;;  %2656 = vrcp.f32 %v1424_v37  ;;  %v1425_v36 = vadd.f32 1.0, %v2629_v46  ;;  %v2266_v26 = vmul.f32 -1.442695, %v3299_v27  ;;  %3796 = vst [vmem:[#allocation27_spill] sm:$0xff] %v3404_v19  ;;  %v3406_v50 = vpop.f32.mrf.mxu0 }
 0x245   : > { %v3384_v28 = vpop.eup %2632  ;;  %v3387_v16 = vrot.slane %v1936_v55, %v3370_v22  ;;  %2658 = vrcp.f32 %v1423_v58  ;;  %v2268_v5 = vmul.f32 -1.442695, %v3301_v53  ;;  %v2277_v17 = vmul.f32 -1.442695, %v3315_v7  ;;  %3797 = vst [vmem:[#allocation28_spill] sm:$0xff] %v3406_v50 }
 0x246   : > { %v3390_v9 = vpop.eup %2634  ;;  %v3393_v57 = vrot.slane %v1937_v3, %v3370_v22  ;;  %2660 = vrcp.f32 %v1425_v36  ;;  %v2279_v23 = vmul.f32 -1.442695, %v3317_v8  ;;  %v2278_v12 = vmul.f32 -1.442695, %v3329_v18  ;;  %v3422_v3 = vpop.f32.mrf.mxu0 }
 0x247   : > { %3794 = vst [vmem:[#allocation25_spill] sm:$0xff] %v3387_v16  ;;  %v3396_v4 = vpop.eup %2636  ;;  %2662 = vpow2.f32 %v2265_v38  ;;  %v2280_v29 = vmul.f32 -1.442695, %v3331_v30  ;;  %v2289_v46 = vmul.f32 -1.442695, %v3341_v1  ;;  %v3420_v38 = vpop.f32.mrf.mxu1  ;;  %3799 = vst [vmem:[#allocation30_spill] sm:$0xff] %v3422_v3 }
 0x248   : > { %3795 = vst [vmem:[#allocation26_spill] sm:$0xff] %v3393_v57  ;;  %v3399_v15 = vpop.eup %2638  ;;  %2664 = vpow2.f32 %v2267_v52  ;;  %v2291_v58 = vmul.f32 -1.442695, %v3343_v39  ;;  %3798 = vst [vmem:[#allocation29_spill] sm:$0xff] %v3420_v38  ;;  %v2290_v52 = vmul.f32 -1.442695, %v3355_v34  ;;  %v3445_v33 = vpop.f32.mrf.mxu0 }
 0x249   : > { %v3408_v24 = vpop.eup %2640  ;;  %2666 = vpow2.f32 %v2266_v26  ;;  %v2301_v11 = vmul.f32 -1.442695, %v3359_v43  ;;  %v2947_v57 = vmov 0.0   ;;  %v3443_v16 = vpop.f32.mrf.mxu1  ;;  %3804 = vst [vmem:[#allocation33_spill] sm:$0xff] %v3445_v33 }
 0x24a   : > { %v3411_v60 = vpop.eup %2642  ;;  %2668 = vpow2.f32 %v2268_v5  ;;  %v2292_v5 = vmul.f32 -1.442695, %v3357_v61  ;;  %237 = vst.msk [vmem:[#allocation2 + $0x8] sm:$0xf] %vm3431_vm5, %v2947_v57  ;;  %3803 = vst [vmem:[#allocation32_spill] sm:$0xff] %v3443_v16  ;;  %v3457_v43 = vpop.f32.mrf.mxu0 }
 0x24b   : > { %v3414_v37 = vpop.eup %2644  ;;  %2670 = vpow2.f32 %v2277_v17  ;;  %v3800_v17 = vmov 0  ;;  %3806 = vst [vmem:[#allocation35_spill] sm:$0xff] %v3457_v43 }
 0x24c   : > { %v3417_v55 = vpop.eup %2646  ;;  %2672 = vpow2.f32 %v2279_v23  ;;  %v3801_v17 = vsel %vm3431_vm5, 4294967295, %v3800_v17  ;;  %v3467_v8 = vpop.f32.mrf.mxu0 }
 0x24d   : > { %v3424_v36 = vpop.eup %2648  ;;  %2674 = vpow2.f32 %v2278_v12  ;;  %3802 = vst [vmem:[#allocation31_spill] sm:$0xff] %v3801_v17  ;;  %v2304_v17 = vmul.f32 -1.442695, %v3365_v42  ;;  %3808 = vst [vmem:[#allocation37_spill] sm:$0xff] %v3467_v8 }
 0x24e   : > { %v3427_v26 = vpop.eup %2650  ;;  %2676 = vpow2.f32 %v2280_v29  ;;  %v2303_v29 = vmul.f32 -1.442695, %v3361_v14  ;;  %v3455_v14 = vpop.f32.mrf.mxu1 }
 0x24f   : > { %v3435_v23 = vpop.eup %2652  ;;  %2678 = vpow2.f32 %v2289_v46  ;;  %v2302_v46 = vmul.f32 -1.442695, %v3363_v35  ;;  %3805 = vst [vmem:[#allocation34_spill] sm:$0xff] %v3455_v14 }
 0x250   : > { %v3440_v12 = vpop.eup %2654  ;;  %2680 = vpow2.f32 %v2291_v58  ;;  %v3465_v18 = vpop.f32.mrf.mxu1 }
 0x251   : > { %v3447_v22 = vpop.eup %2656  ;;  %2682 = vpow2.f32 %v2290_v52  ;;  %3807 = vst [vmem:[#allocation36_spill] sm:$0xff] %v3465_v18 }
 0x252   : > { %v3450_v61 = vpop.eup %2658  ;;  %2684 = vpow2.f32 %v2292_v5 }
 0x253   : > { %v3453_v57 = vpop.eup %2660  ;;  %2686 = vpow2.f32 %v2301_v11  ;;  %v3460_v11 = vmul.f32 -1.442695, %v3372_v47 }
 0x254   : > { %v2663_v58 = vpop.eup %2662  ;;  %2688 = vpow2.f32 %v2303_v29  ;;  %v3463_v29 = vmul.f32 -1.442695, %v3374_v10 }
 0x255   : > { %v2665_v34 = vpop.eup %2664  ;;  %v1434_v39 = vadd.f32 1.0, %v2663_v58  ;;  %2690 = vpow2.f32 %v2302_v46  ;;  %v3476_v58 = vmul.f32 -1.442695, %v3404_v19  ;;  %v3495_v19 = vpop.f32.mrf.mxu0 }
 0x256   : > { %v2667_v52 = vpop.eup %2666  ;;  %v1436_v30 = vadd.f32 1.0, %v2665_v34  ;;  %2692 = vpow2.f32 %v2304_v17  ;;  %v3470_v17 = vmul.f32 -1.442695, %v3380_v51  ;;  %3812 = vst [vmem:[#allocation41_spill] sm:$0xff] %v3495_v19 }
 0x257   : > { %v2669_v35 = vpop.eup %2668  ;;  %2694 = vrcp.f32 %v1434_v39  ;;  %v1435_v5 = vadd.f32 1.0, %v2667_v52  ;;  %v3473_v39 = vmul.f32 -1.442695, %v3382_v54  ;;  %v3479_v52 = vmul.f32 -1.442695, %v3406_v50  ;;  %v3493_v50 = vpop.f32.mrf.mxu1 }
 0x258   : > { %v2671_v1 = vpop.eup %2670  ;;  %2696 = vrcp.f32 %v1436_v30  ;;  %v1437_v42 = vadd.f32 1.0, %v2669_v35  ;;  %3811 = vst [vmem:[#allocation40_spill] sm:$0xff] %v3493_v50 }
 0x259   : > { %v2673_v46 = vpop.eup %2672  ;;  %2698 = vrcp.f32 %v1435_v5  ;;  %v1446_v34 = vadd.f32 1.0, %v2671_v1  ;;  %v3482_v1 = vmul.f32 -1.442695, %v3420_v38  ;;  %v3485_v5 = vmul.f32 -1.442695, %v3422_v3 }
 0x25a   : > { %v2675_v30 = vpop.eup %2674  ;;  %2700 = vrcp.f32 %v1437_v42  ;;  %v1448_v35 = vadd.f32 1.0, %v2673_v46  ;;  %v3488_v42 = vmul.f32 -1.442695, %v3443_v16  ;;  %v3491_v46 = vmul.f32 -1.442695, %v3445_v33 }
 0x25b   : > { %v2677_v10 = vpop.eup %2676  ;;  %2702 = vrcp.f32 %v1446_v34  ;;  %v1447_v47 = vadd.f32 1.0, %v2675_v30  ;;  %v3498_v38 = vmul.f32 -1.442695, %v3455_v14  ;;  %v3501_v3 = vmul.f32 -1.442695, %v3457_v43 }
 0x25c   : > { %v2679_v54 = vpop.eup %2678  ;;  %2704 = vrcp.f32 %v1448_v35  ;;  %v1449_v51 = vadd.f32 1.0, %v2677_v10  ;;  %3809 = vst [vmem:[#allocation38_spill] sm:$0xff] %v3488_v42  ;;  %3810 = vst [vmem:[#allocation39_spill] sm:$0xff] %v3491_v46  ;;  %v3504_v16 = vmul.f32 -1.442695, %v3465_v18  ;;  %v1677_v14 = vmul.f32 %v3396_v4, %v3231_v32 }
 0x25d   : > { %v2681_v34 = vpop.eup %2680  ;;  %2706 = vrcp.f32 %v1447_v47  ;;  %v1458_v30 = vadd.f32 1.0, %v2679_v54  ;;  %v3507_v33 = vmul.f32 -1.442695, %v3467_v8  ;;  %v3510_v47 = vmul.f32 -1.442695, %v3493_v50 }
 0x25e   : > { %v2683_v10 = vpop.eup %2682  ;;  %2708 = vrcp.f32 %v1449_v51  ;;  %v1460_v35 = vadd.f32 1.0, %v2681_v34  ;;  %v3513_v54 = vmul.f32 -1.442695, %v3495_v19  ;;  %v1674_v51 = vmul.f32 %v3377_v6, %v3223_v20 }
 0x25f   : > { %v2685_v46 = vpop.eup %2684  ;;  %2710 = vrcp.f32 %v1458_v30  ;;  %v1459_v42 = vadd.f32 1.0, %v2683_v10  ;;  %v1676_v34 = vmul.f32 %v3384_v28, %v3225_v21  ;;  %v1675_v30 = vmul.f32 %v3390_v9, %v3229_v31 }
 0x260   : > { %v2687_v43 = vpop.eup %2686  ;;  %2712 = vrcp.f32 %v1460_v35  ;;  %v1461_v18 = vadd.f32 1.0, %v2685_v46  ;;  %v1686_v10 = vmul.f32 %v3399_v15, %v3237_v41  ;;  %v1688_v20 = vmul.f32 %v3408_v24, %v3239_v44  ;;  %v3814_v35 = vld [vmem:[#allocation10_spill] sm:$0xff] }
 0x261   : > { %v2689_v8 = vpop.eup %2688  ;;  %2714 = vrcp.f32 %v1459_v42  ;;  %v1470_v50 = vadd.f32 1.0, %v2687_v43  ;;  %v1687_v28 = vmul.f32 %v3411_v60, %v3251_v49  ;;  %v1689_v31 = vmul.f32 %v3414_v37, %v3253_v56 }
 0x262   : > { %v2691_v19 = vpop.eup %2690  ;;  %2716 = vrcp.f32 %v1461_v18  ;;  %v1472_v21 = vadd.f32 1.0, %v2689_v8  ;;  %v1698_v43 = vmul.f32 %v3417_v55, %v3263_v45  ;;  %v1700_v32 = vmul.f32 %v3424_v36, %v3265_v0 }
 0x263   : > { %v2693_v6 = vpop.eup %2692  ;;  %2718 = vrcp.f32 %v1470_v50  ;;  %v1471_v41 = vadd.f32 1.0, %v2691_v19  ;;  %v1820_v8 = vadd.f32 %v1686_v10, %v1674_v51  ;;  %v1699_v4 = vmul.f32 %v3427_v26, %v3277_v13  ;;  %v3815_v51 = vld [vmem:[#allocation12_spill] sm:$0xff]  ;;  %v3817_v10 = vld [vmem:[#allocation13_spill] sm:$0xff] }
 0x264   : > { %v2695_v9 = vpop.eup %2694  ;;  %2720 = vrcp.f32 %v1472_v21  ;;  %v1473_v44 = vadd.f32 1.0, %v2693_v6  ;;  %v1701_v49 = vmul.f32 %v3435_v23, %v3279_v48  ;;  %v1846_v15 = vadd.f32 %v1688_v20, %v1676_v34 }
 0x265   : > { %v2697_v18 = vpop.eup %2696  ;;  %2722 = vrcp.f32 %v1471_v41  ;;  %v1710_v19 = vmul.f32 %v3440_v12, %v3285_v59  ;;  %v1712_v45 = vmul.f32 %v3447_v22, %v3287_v25  ;;  %v1833_v50 = vadd.f32 %v1687_v28, %v1675_v30  ;;  %v3816_v30 = vld [vmem:[#allocation11_spill] sm:$0xff] }
 0x266   : > { %v2699_v56 = vpop.eup %2698  ;;  %2724 = vrcp.f32 %v1473_v44  ;;  %v1859_v24 = vadd.f32 %v1689_v31, %v1677_v14  ;;  %v1711_v60 = vmul.f32 %v3450_v61, %v3289_v63  ;;  %v1821_v48 = vadd.f32 %v1820_v8, %v1698_v43  ;;  %v3819_v31 = vld [vmem:[#allocation38_spill] sm:$0xff]  ;;  %v3821_v44 = vld [vmem:[#allocation39_spill] sm:$0xff] }
 0x267   : > { %v2701_v0 = vpop.eup %2700  ;;  %2726 = vpow2.f32 %v3460_v11  ;;  %v1847_v37 = vadd.f32 %v1846_v15, %v1700_v32  ;;  %v1713_v55 = vmul.f32 %v3453_v57, %v3291_v40  ;;  %v1834_v36 = vadd.f32 %v1833_v50, %v1699_v4  ;;  %v3820_v32 = vld [vmem:[#allocation15_spill] sm:$0xff]  ;;  %v3573_v50 = vpop.f32.mrf.mxu1 }
 0x268   : > { %v2703_v13 = vpop.eup %2702  ;;  %2728 = vpow2.f32 %v3463_v29  ;;  %v1860_v25 = vadd.f32 %v1859_v24, %v1701_v49  ;;  %v1722_v22 = vmul.f32 %v2695_v9, %v3293_v62  ;;  %v1822_v26 = vadd.f32 %v1821_v48, %v1710_v19  ;;  %v3822_v49 = vld [vmem:[#allocation16_spill] sm:$0xff]  ;;  %v3824_v48 = vld [vmem:[#allocation18_spill] sm:$0xff] }
 0x269   : > { %v2705_v59 = vpop.eup %2704  ;;  %2730 = vpow2.f32 %v3470_v17  ;;  %v1848_v63 = vadd.f32 %v1847_v37, %v1712_v45  ;;  %v1724_v61 = vmul.f32 %v2697_v18, %v3295_v2  ;;  %v1835_v12 = vadd.f32 %v1834_v36, %v1711_v60  ;;  %v3813_v17 = vld [vmem:[#allocation9_spill] sm:$0xff] }
 0x26a   : > { %v2707_v14 = vpop.eup %2706  ;;  %2732 = vpow2.f32 %v3473_v39  ;;  %v1723_v40 = vmul.f32 %v2699_v56, %v3299_v27  ;;  %v1734_v57 = vmul.f32 %v2703_v13, %v3315_v7  ;;  %v1861_v29 = vadd.f32 %v1860_v25, %v1713_v55  ;;  %v3823_v45 = vld [vmem:[#allocation17_spill] sm:$0xff]  ;;  %v3577_v55 = vpop.f32.mrf.mxu0  ;;  %v3825_v25 = vld [vmem:[#allocation19_spill] sm:$0xff] }
 0x26b   : > { %v2709_v23 = vpop.eup %2708  ;;  %2734 = vpow2.f32 %v3476_v58  ;;  %v1725_v62 = vmul.f32 %v2701_v0, %v3301_v53  ;;  %v1736_v42 = vmul.f32 %v2705_v59, %v3813_v17  ;;  %v1823_v2 = vadd.f32 %v1822_v26, %v1722_v22 }
 0x26c   : > { %v2711_v11 = vpop.eup %2710  ;;  %2736 = vpow2.f32 %v3479_v52  ;;  %v1735_v39 = vmul.f32 %v2707_v14, %v3814_v35  ;;  %v1849_v7 = vadd.f32 %v1848_v63, %v1724_v61  ;;  %v1737_v58 = vmul.f32 %v2709_v23, %v3816_v30  ;;  %v3818_v52 = vld [vmem:[#allocation14_spill] sm:$0xff] }
 0x26d   : > { %v2713_v46 = vpop.eup %2712  ;;  %v1746_v34 = vmul.f32 %v2711_v11, %v3815_v51  ;;  %2738 = vpow2.f32 %v3482_v1  ;;  %v1836_v21 = vadd.f32 %v1835_v12, %v1723_v40  ;;  %v1824_v6 = vadd.f32 %v1823_v2, %v1734_v57 }
 0x26e   : > { %v2715_v27 = vpop.eup %2714  ;;  %v1748_v20 = vmul.f32 %v2713_v46, %v3817_v10  ;;  %2740 = vpow2.f32 %v3485_v5  ;;  %v1862_v9 = vadd.f32 %v1861_v29, %v1725_v62  ;;  %v1850_v43 = vadd.f32 %v1849_v7, %v1736_v42 }
 0x26f   : > { %v2717_v53 = vpop.eup %2716  ;;  %v1747_v28 = vmul.f32 %v2715_v27, %v3818_v52  ;;  %2742 = vpow2.f32 %v3819_v31  ;;  %v1837_v8 = vadd.f32 %v1836_v21, %v1735_v39  ;;  %v1825_v4 = vadd.f32 %v1824_v6, %v1746_v34 }
 0x270   : > { %v2719_v41 = vpop.eup %2718  ;;  %v1749_v1 = vmul.f32 %v2717_v53, %v3820_v32  ;;  %2744 = vpow2.f32 %v3821_v44  ;;  %v1863_v15 = vadd.f32 %v1862_v9, %v1737_v58  ;;  %v1851_v19 = vadd.f32 %v1850_v43, %v1748_v20 }
 0x271   : > { %v2721_v18 = vpop.eup %2720  ;;  %v1758_v56 = vmul.f32 %v2719_v41, %v3822_v49  ;;  %2746 = vpow2.f32 %v3498_v38  ;;  %v1838_v60 = vadd.f32 %v1837_v8, %v1747_v28 }
 0x272   : > { %v2723_v5 = vpop.eup %2722  ;;  %v1760_v0 = vmul.f32 %v2721_v18, %v3823_v45  ;;  %2748 = vpow2.f32 %v3501_v3  ;;  %v1864_v38 = vadd.f32 %v1863_v15, %v1749_v1 }
 0x273   : > { %v2725_v24 = vpop.eup %2724  ;;  %v1826_v13 = vadd.f32 %v1825_v4, %v1758_v56  ;;  %v1759_v37 = vmul.f32 %v2723_v5, %v3824_v48  ;;  %2750 = vpow2.f32 %v3504_v16  ;;  %v3583_v16 = vpop.f32.mrf.mxu1 }
 0x274   : > { %v2727_v59 = vpop.eup %2726  ;;  %v1852_v36 = vadd.f32 %v1851_v19, %v1760_v0  ;;  %v1761_v22 = vmul.f32 %v2725_v24, %v3825_v25  ;;  %2752 = vpow2.f32 %v3507_v33  ;;  %v3585_v33 = vpop.f32.mrf.mxu0 }
 0x275   : > { %v2729_v14 = vpop.eup %2728  ;;  %v1827_v3 = vrot.slane %v1826_v13, 4  ;;  %v1839_v26 = vadd.f32 %v1838_v60, %v1759_v37  ;;  %v1390_v63 = vadd.f32 1.0, %v2727_v59  ;;  %2754 = vpow2.f32 %v3510_v47  ;;  %v3587_v30 = vpop.f32.mrf.mxu1 }
 0x276   : > { %v2731_v61 = vpop.eup %2730  ;;  %v1853_v23 = vrot.slane %v1852_v36, 4  ;;  %v1865_v12 = vadd.f32 %v1864_v38, %v1761_v22  ;;  %v1392_v40 = vadd.f32 1.0, %v2729_v14  ;;  %2756 = vpow2.f32 %v3513_v54  ;;  %v3589_v21 = vpop.f32.mrf.mxu0 }
 0x277   : > { %v2733_v57 = vpop.eup %2732  ;;  %v1828_v11 = vadd.f32 %v1827_v3, %v1826_v13  ;;  %v1840_v29 = vrot.slane %v1839_v26, 4  ;;  %2758 = vrcp.f32 %v1390_v63  ;;  %v1391_v62 = vadd.f32 1.0, %v2731_v61  ;;  %v3591_v4 = vpop.f32.mrf.mxu1 }
 0x278   : > { %v2735_v17 = vpop.eup %2734  ;;  %v1854_v42 = vadd.f32 %v1853_v23, %v1852_v36  ;;  %v1866_v46 = vrot.slane %v1865_v12, 4  ;;  %2760 = vrcp.f32 %v1392_v40  ;;  %v1393_v47 = vadd.f32 1.0, %v2733_v57  ;;  %v3593_v15 = vpop.f32.mrf.mxu0 }
 0x279   : > { %v2737_v2 = vpop.eup %2736  ;;  %v1829_v35 = vrot.slane %v1828_v11, 2  ;;  %v1841_v39 = vadd.f32 %v1840_v29, %v1839_v26  ;;  %2762 = vrcp.f32 %v1391_v62  ;;  %v1402_v51 = vadd.f32 1.0, %v2735_v17  ;;  %v3595_v25 = vpop.f32.mrf.mxu1 }
 0x27a   : > { %v2739_v54 = vpop.eup %2738  ;;  %v1855_v34 = vrot.slane %v1854_v42, 2  ;;  %v1867_v27 = vadd.f32 %v1866_v46, %v1865_v12  ;;  %2764 = vrcp.f32 %v1393_v47  ;;  %v1404_v7 = vadd.f32 1.0, %v2737_v2  ;;  %v3598_v63 = vpop.f32.mrf.mxu0 }
 0x27b   : > { %v2741_v58 = vpop.eup %2740  ;;  %v1830_v10 = vadd.f32 %v1829_v35, %v1828_v11  ;;  %v1842_v20 = vrot.slane %v1841_v39, 2  ;;  %2766 = vrcp.f32 %v1402_v51  ;;  %v1403_v53 = vadd.f32 1.0, %v2739_v54  ;;  %v3826_v11 = vld [vmem:[#allocation20_spill] sm:$0xff]  ;;  %v3611_v47 = vpop.f32.mrf.mxu1 }
 0x27c   : > { %v2743_v6 = vpop.eup %2742  ;;  %v1856_v52 = vadd.f32 %v1855_v34, %v1854_v42  ;;  %v1868_v28 = vrot.slane %v1867_v27, 2  ;;  %2768 = vrcp.f32 %v1404_v7  ;;  %v1405_v31 = vadd.f32 1.0, %v2741_v58 }
 0x27d   : > { %v2745_v41 = vpop.eup %2744  ;;  %v1831_v9 = vrot.slane %v1830_v10, 1  ;;  %v1843_v43 = vadd.f32 %v1842_v20, %v1841_v39  ;;  %2770 = vrcp.f32 %v1403_v53  ;;  %v1414_v32 = vadd.f32 1.0, %v2743_v6  ;;  %v3616_v39 = vpop.f32.mrf.mxu0  ;;  %v3828_v20 = vld [vmem:[#allocation26_spill] sm:$0xff] }
 0x27e   : > { %v2747_v1 = vpop.eup %2746  ;;  %v1857_v44 = vrot.slane %v1856_v52, 1  ;;  %v1869_v18 = vadd.f32 %v1868_v28, %v1867_v27  ;;  %2772 = vrcp.f32 %v1405_v31  ;;  %v1416_v8 = vadd.f32 1.0, %v2745_v41  ;;  %v3632_v31 = vpop.f32.mrf.mxu1 }
 0x27f   : > { %v2749_v49 = vpop.eup %2748  ;;  %v1844_v56 = vrot.slane %v1843_v43, 1  ;;  %2774 = vrcp.f32 %v1414_v32  ;;  %v1415_v5 = vadd.f32 1.0, %v2747_v1  ;;  %v1832_v60 = vadd.f32 %v1831_v9, %v1830_v10  ;;  %v3827_v10 = vld [vmem:[#allocation25_spill] sm:$0xff] }
 0x280   : > { %v2751_v19 = vpop.eup %2750  ;;  %v1870_v45 = vrot.slane %v1869_v18, 1  ;;  %2776 = vrcp.f32 %v1416_v8  ;;  %v1417_v0 = vadd.f32 1.0, %v2749_v49  ;;  %v1858_v59 = vadd.f32 %v1857_v44, %v1856_v52 }
 0x281   : > { %v2753_v24 = vpop.eup %2752  ;;  %v1845_v13 = vadd.f32 %v1844_v56, %v1843_v43  ;;  %2778 = vrcp.f32 %v1415_v5  ;;  %v1426_v48 = vadd.f32 1.0, %v2751_v19  ;;  %v2269_v26 = vmul.f32 -1.442695, %v3573_v50  ;;  %v3638_v43 = vpop.f32.mrf.mxu0 }
 0x282   : > { %v2755_v37 = vpop.eup %2754  ;;  %v1871_v38 = vadd.f32 %v1870_v45, %v1869_v18  ;;  %2780 = vrcp.f32 %v1417_v0  ;;  %v1428_v36 = vadd.f32 1.0, %v2753_v24  ;;  %v2271_v40 = vmul.f32 -1.442695, %v3577_v55  ;;  %v3649_v5 = vpop.f32.mrf.mxu1 }
 0x283   : > { %v2757_v22 = vpop.eup %2756  ;;  %v1938_v14 = vcombine.low %v1832_v60, %v1845_v13  ;;  %2782 = vrcp.f32 %v1426_v48  ;;  %v1427_v3 = vadd.f32 1.0, %v2755_v37  ;;  %v2270_v62 = vmul.f32 -1.442695, %v3583_v16  ;;  %v3659_v0 = vpop.f32.mrf.mxu0 }
 0x284   : > { %v3600_v61 = vpop.eup %2758  ;;  %v1939_v23 = vcombine.low %v1858_v59, %v1871_v38  ;;  %2784 = vrcp.f32 %v1428_v36  ;;  %v1429_v12 = vadd.f32 1.0, %v2757_v22  ;;  %v2272_v46 = vmul.f32 -1.442695, %v3585_v33 }
 0x285   : > { %v3603_v57 = vpop.eup %2760  ;;  %v1960_v29 = vrot.slane %v1938_v14, %v3826_v11  ;;  %2786 = vrcp.f32 %v1427_v3  ;;  %v2281_v35 = vmul.f32 -1.442695, %v3587_v30  ;;  %v2283_v34 = vmul.f32 -1.442695, %v3589_v21 }
 0x286   : > { %v3607_v17 = vpop.eup %2762  ;;  %v1967_v42 = vrot.slane %v1939_v23, %v3826_v11  ;;  %2788 = vrcp.f32 %v1429_v12  ;;  %v2282_v7 = vmul.f32 -1.442695, %v3591_v4  ;;  %v3829_v53 = vcombine.low %v3827_v10, %v3828_v20 }
 0x287   : > { %v3613_v2 = vpop.eup %2764  ;;  %2790 = vpow2.f32 %v2269_v26  ;;  %v2284_v28 = vmul.f32 -1.442695, %v3593_v15  ;;  %v2293_v9 = vmul.f32 -1.442695, %v3595_v25  ;;  %v2295_v44 = vmul.f32 -1.442695, %v3598_v63 }
 0x288   : > { %v3618_v51 = vpop.eup %2766  ;;  %v1969_v54 = vcombine.low %v1960_v29, %v1967_v42  ;;  %2792 = vpow2.f32 %v2271_v40  ;;  %v1976_v6 = vrot.slane %v3829_v53, %v3826_v11  ;;  %v2294_v8 = vmul.f32 -1.442695, %v3611_v47 }
 0x289   : > { %v3621_v27 = vpop.eup %2768  ;;  %2794 = vpow2.f32 %v2270_v62  ;;  %v2296_v56 = vmul.f32 -1.442695, %v3616_v39  ;;  %v2305_v45 = vmul.f32 -1.442695, %v3632_v31  ;;  %v2307_v13 = vmul.f32 -1.442695, %v3638_v43 }
 0x28a   : > { %v3624_v58 = vpop.eup %2770  ;;  %v1983_v52 = vrot.slane %v1969_v54, %v3826_v11  ;;  %2796 = vpow2.f32 %v2272_v46  ;;  %v2306_v37 = vmul.f32 -1.442695, %v3649_v5  ;;  %v2308_v38 = vmul.f32 -1.442695, %v3659_v0 }
 0x28b   : > { %v3634_v41 = vpop.eup %2772  ;;  %2798 = vpow2.f32 %v2281_v35 }
 0x28c   : > { %v3640_v32 = vpop.eup %2774  ;;  %v1984_v1 = vcombine.low %v1976_v6, %v1983_v52  ;;  %2800 = vpow2.f32 %v2283_v34 }
 0x28d   : > { %v3643_v18 = vpop.eup %2776  ;;  %2802 = vpow2.f32 %v2282_v7 }
 0x28e   : > { %v3646_v49 = vpop.eup %2778  ;;  %2804 = vpow2.f32 %v2284_v28  ;;  %v2024_v60 = vmul.f32 0.015625, %v1984_v1 }
 0x28f   : > { %v3651_v19 = vpop.eup %2780  ;;  %2806 = vpow2.f32 %v2293_v9 }
 0x290   : > { %v3661_v24 = vpop.eup %2782  ;;  %2808 = vpow2.f32 %v2295_v44  ;;  %2026 = vst [vmem:[%s3656_s17] sm:$0xff] %v2024_v60 }
 0x291   : > { %v3664_v48 = vpop.eup %2784  ;;  %2810 = vpow2.f32 %v2294_v8 }
 0x292   : > { %v3667_v59 = vpop.eup %2786  ;;  %2812 = vpow2.f32 %v2296_v56 }
 0x293   : > { %v3671_v36 = vpop.eup %2788  ;;  %2814 = vpow2.f32 %v2305_v45 }
 0x294   : > { %v2791_v22 = vpop.eup %2790  ;;  %2816 = vpow2.f32 %v2307_v13 }
 0x295   : > { %v2793_v14 = vpop.eup %2792  ;;  %v1438_v3 = vadd.f32 1.0, %v2791_v22  ;;  %2818 = vpow2.f32 %v2306_v37 }
 0x296   : > { %v2795_v26 = vpop.eup %2794  ;;  %v1440_v23 = vadd.f32 1.0, %v2793_v14  ;;  %2820 = vpow2.f32 %v2308_v38  ;;  %v3830_v38 = vld [vmem:[#allocation27_spill] sm:$0xff] }
 0x297   : > { %v2797_v12 = vpop.eup %2796  ;;  %2822 = vrcp.f32 %v1438_v3  ;;  %v1439_v40 = vadd.f32 1.0, %v2795_v26  ;;  %v1690_v22 = vmul.f32 %v3618_v51, %v3830_v38  ;;  %v3831_v26 = vld [vmem:[#allocation28_spill] sm:$0xff] }
 0x298   : > { %v2799_v29 = vpop.eup %2798  ;;  %2824 = vrcp.f32 %v1440_v23  ;;  %v1441_v62 = vadd.f32 1.0, %v2797_v12  ;;  %v1692_v23 = vmul.f32 %v3621_v27, %v3831_v26  ;;  %v3844_v38 = vld [vmem:[#allocation40_spill] sm:$0xff] }
 0x299   : > { %v2801_v42 = vpop.eup %2800  ;;  %2826 = vrcp.f32 %v1439_v40  ;;  %v1450_v46 = vadd.f32 1.0, %v2799_v29  ;;  %v3832_v29 = vld [vmem:[#allocation21_spill] sm:$0xff] }
 0x29a   : > { %v2803_v35 = vpop.eup %2802  ;;  %2828 = vrcp.f32 %v1441_v62  ;;  %v1452_v54 = vadd.f32 1.0, %v2801_v42  ;;  %v1678_v62 = vmul.f32 %v3600_v61, %v3832_v29  ;;  %v3833_v42 = vld [vmem:[#allocation29_spill] sm:$0xff]  ;;  %v3838_v61 = vld [vmem:[#allocation23_spill] sm:$0xff] }
 0x29b   : > { %v2805_v34 = vpop.eup %2804  ;;  %2830 = vrcp.f32 %v1450_v46  ;;  %v1451_v7 = vadd.f32 1.0, %v2803_v35  ;;  %v1691_v46 = vmul.f32 %v3624_v58, %v3833_v42  ;;  %v3834_v35 = vld [vmem:[#allocation32_spill] sm:$0xff] }
 0x29c   : > { %v2807_v10 = vpop.eup %2806  ;;  %2832 = vrcp.f32 %v1452_v54  ;;  %v1453_v20 = vadd.f32 1.0, %v2805_v34  ;;  %v1702_v54 = vmul.f32 %v3640_v32, %v3834_v35  ;;  %v3835_v34 = vld [vmem:[#allocation22_spill] sm:$0xff]  ;;  %v1872_v58 = vadd.f32 %v1690_v22, %v1678_v62 }
 0x29d   : > { %v2809_v53 = vpop.eup %2808  ;;  %2834 = vrcp.f32 %v1451_v7  ;;  %v1462_v6 = vadd.f32 1.0, %v2807_v10  ;;  %v1680_v7 = vmul.f32 %v3603_v57, %v3835_v34  ;;  %v3836_v10 = vld [vmem:[#allocation30_spill] sm:$0xff]  ;;  %v3841_v57 = vld [vmem:[#allocation24_spill] sm:$0xff] }
 0x29e   : > { %v2811_v52 = vpop.eup %2810  ;;  %2836 = vrcp.f32 %v1453_v20  ;;  %v1464_v28 = vadd.f32 1.0, %v2809_v53  ;;  %v1693_v27 = vmul.f32 %v3634_v41, %v3836_v10  ;;  %v3837_v20 = vld [vmem:[#allocation33_spill] sm:$0xff] }
 0x29f   : > { %v2813_v9 = vpop.eup %2812  ;;  %2838 = vrcp.f32 %v1462_v6  ;;  %v1463_v1 = vadd.f32 1.0, %v2811_v52  ;;  %v1704_v53 = vmul.f32 %v3643_v18, %v3837_v20  ;;  %v1679_v52 = vmul.f32 %v3607_v17, %v3838_v61 }
 0x2a0   : > { %v2815_v44 = vpop.eup %2814  ;;  %2840 = vrcp.f32 %v1464_v28  ;;  %v1465_v8 = vadd.f32 1.0, %v2813_v9  ;;  %v3839_v28 = vld [vmem:[#allocation34_spill] sm:$0xff]  ;;  %v3840_v9 = vld [vmem:[#allocation36_spill] sm:$0xff]  ;;  %v1898_v41 = vadd.f32 %v1692_v23, %v1680_v7 }
 0x2a1   : > { %v2817_v56 = vpop.eup %2816  ;;  %2842 = vrcp.f32 %v1463_v1  ;;  %v1474_v45 = vadd.f32 1.0, %v2815_v44  ;;  %v1703_v32 = vmul.f32 %v3646_v49, %v3839_v28  ;;  %v1714_v1 = vmul.f32 %v3661_v24, %v3840_v9 }
 0x2a2   : > { %v2819_v60 = vpop.eup %2818  ;;  %2844 = vrcp.f32 %v1465_v8  ;;  %v1476_v13 = vadd.f32 1.0, %v2817_v56  ;;  %v1681_v8 = vmul.f32 %v3613_v2, %v3841_v57  ;;  %v3842_v56 = vld [vmem:[#allocation35_spill] sm:$0xff]  ;;  %v1885_v17 = vadd.f32 %v1691_v46, %v1679_v52 }
 0x2a3   : > { %v2821_v37 = vpop.eup %2820  ;;  %2846 = vrcp.f32 %v1474_v45  ;;  %v1475_v14 = vadd.f32 1.0, %v2819_v60  ;;  %v1705_v18 = vmul.f32 %v3651_v19, %v3842_v56  ;;  %v3843_v45 = vld [vmem:[#allocation37_spill] sm:$0xff]  ;;  %v1715_v49 = vmul.f32 %v3667_v59, %v3844_v38 }
 0x2a4   : > { %v2823_v3 = vpop.eup %2822  ;;  %2848 = vrcp.f32 %v1476_v13  ;;  %v1477_v12 = vadd.f32 1.0, %v2821_v37  ;;  %v1716_v60 = vmul.f32 %v3664_v48, %v3843_v45  ;;  %v1873_v37 = vadd.f32 %v1872_v58, %v1702_v54 }
 0x2a5   : > { %v2825_v40 = vpop.eup %2824  ;;  %2850 = vrcp.f32 %v1475_v14  ;;  %v1726_v22 = vmul.f32 %v2823_v3, %v3573_v50  ;;  %v1911_v14 = vadd.f32 %v1693_v27, %v1681_v8  ;;  %v1899_v26 = vadd.f32 %v1898_v41, %v1704_v53 }
 0x2a6   : > { %v2827_v51 = vpop.eup %2826  ;;  %2852 = vrcp.f32 %v1477_v12  ;;  %v3845_v12 = vld [vmem:[#allocation41_spill] sm:$0xff]  ;;  %v1728_v23 = vmul.f32 %v2825_v40, %v3577_v55  ;;  %v1886_v29 = vadd.f32 %v1885_v17, %v1703_v32  ;;  %v1874_v62 = vadd.f32 %v1873_v37, %v1714_v1 }
 0x2a7   : > { %v2829_v6 = vpop.eup %2828  ;;  %v1717_v2 = vmul.f32 %v3671_v36, %v3845_v12  ;;  %v1727_v48 = vmul.f32 %v2827_v51, %v3583_v16  ;;  %v1912_v35 = vadd.f32 %v1911_v14, %v1705_v18  ;;  %v1900_v59 = vadd.f32 %v1899_v26, %v1716_v60 }
 0x2a8   : > { %v2831_v44 = vpop.eup %2830  ;;  %v1729_v50 = vmul.f32 %v2829_v6, %v3585_v33  ;;  %v1887_v34 = vadd.f32 %v1886_v29, %v1715_v49  ;;  %v1875_v7 = vadd.f32 %v1874_v62, %v1726_v22 }
 0x2a9   : > { %v2833_v13 = vpop.eup %2832  ;;  %v1738_v42 = vmul.f32 %v2831_v44, %v3587_v30  ;;  %v1913_v10 = vadd.f32 %v1912_v35, %v1717_v2  ;;  %v1901_v27 = vadd.f32 %v1900_v59, %v1728_v23 }
 0x2aa   : > { %v2835_v24 = vpop.eup %2834  ;;  %v1740_v3 = vmul.f32 %v2833_v13, %v3589_v21  ;;  %v1888_v20 = vadd.f32 %v1887_v34, %v1727_v48  ;;  %v1767_v34 = vld [vmem:[#allocation2 + $0x8] sm:$0xf] }
 0x2ab   : > { %v2837_v19 = vpop.eup %2836  ;;  %v1739_v36 = vmul.f32 %v2835_v24, %v3591_v4  ;;  %v1876_v53 = vadd.f32 %v1875_v7, %v1738_v42  ;;  %v1914_v6 = vadd.f32 %v1913_v10, %v1729_v50 }
 0x2ac   : > { %v2839_v46 = vpop.eup %2838  ;;  %v1741_v16 = vmul.f32 %v2837_v19, %v3593_v15  ;;  %v1902_v61 = vadd.f32 %v1901_v27, %v1740_v3 }
 0x2ad   : > { %v2841_v54 = vpop.eup %2840  ;;  %v1750_v55 = vmul.f32 %v2839_v46, %v3595_v25  ;;  %v1889_v58 = vadd.f32 %v1888_v20, %v1739_v36 }
 0x2ae   : > { %v2843_v40 = vpop.eup %2842  ;;  %v1752_v30 = vmul.f32 %v2841_v54, %v3598_v63  ;;  %v1915_v9 = vadd.f32 %v1914_v6, %v1741_v16 }
 0x2af   : > { %v2845_v51 = vpop.eup %2844  ;;  %v1751_v33 = vmul.f32 %v2843_v40, %v3611_v47  ;;  %v1877_v25 = vadd.f32 %v1876_v53, %v1750_v55 }
 0x2b0   : > { %v2847_v21 = vpop.eup %2846  ;;  %v1753_v52 = vmul.f32 %v2845_v51, %v3616_v39  ;;  %v1903_v15 = vadd.f32 %v1902_v61, %v1752_v30 }
 0x2b1   : > { %v2849_v4 = vpop.eup %2848  ;;  %v1762_v28 = vmul.f32 %v2847_v21, %v3632_v31  ;;  %v1890_v44 = vadd.f32 %v1889_v58, %v1751_v33 }
 0x2b2   : > { %v2851_v32 = vpop.eup %2850  ;;  %v1764_v63 = vmul.f32 %v2849_v4, %v3638_v43  ;;  %v1916_v8 = vadd.f32 %v1915_v9, %v1753_v52 }
 0x2b3   : > { %v2853_v1 = vpop.eup %2852  ;;  %v1878_v57 = vadd.f32 %v1877_v25, %v1762_v28  ;;  %v1763_v47 = vmul.f32 %v2851_v32, %v3649_v5 }
 0x2b4   : > { %v1904_v41 = vadd.f32 %v1903_v15, %v1764_v63  ;;  %v1765_v56 = vmul.f32 %v2853_v1, %v3659_v0 }
 0x2b5   : > { %v1879_v39 = vrot.slane %v1878_v57, 4  ;;  %v1891_v18 = vadd.f32 %v1890_v44, %v1763_v47 }
 0x2b6   : > { %v1905_v45 = vrot.slane %v1904_v41, 4  ;;  %v1917_v60 = vadd.f32 %v1916_v8, %v1765_v56 }
 0x2b7   : > { %v1880_v13 = vadd.f32 %v1879_v39, %v1878_v57  ;;  %v1892_v31 = vrot.slane %v1891_v18, 4 }
 0x2b8   : > { %v1906_v17 = vadd.f32 %v1905_v45, %v1904_v41  ;;  %v1918_v37 = vrot.slane %v1917_v60, 4 }
 0x2b9   : > { %v1881_v38 = vrot.slane %v1880_v13, 2  ;;  %v1893_v49 = vadd.f32 %v1892_v31, %v1891_v18 }
 0x2ba   : > { %v1907_v43 = vrot.slane %v1906_v17, 2  ;;  %v1919_v22 = vadd.f32 %v1918_v37, %v1917_v60 }
 0x2bb   : > { %v1882_v24 = vadd.f32 %v1881_v38, %v1880_v13  ;;  %v1894_v14 = vrot.slane %v1893_v49, 2 }
 0x2bc   : > { %v1908_v26 = vadd.f32 %v1907_v43, %v1906_v17  ;;  %v1920_v5 = vrot.slane %v1919_v22, 2 }
 0x2bd   : > { %v1883_v12 = vrot.slane %v1882_v24, 1  ;;  %v1895_v2 = vadd.f32 %v1894_v14, %v1893_v49 }
 0x2be   : > { %v1909_v23 = vrot.slane %v1908_v26, 1  ;;  %v1921_v0 = vadd.f32 %v1920_v5, %v1919_v22 }
 0x2bf   : > { %v1896_v19 = vrot.slane %v1895_v2, 1  ;;  %v1884_v62 = vadd.f32 %v1883_v12, %v1882_v24 }
 0x2c0   : > { %v1922_v29 = vrot.slane %v1921_v0, 1  ;;  %v1910_v42 = vadd.f32 %v1909_v23, %v1908_v26 }
 0x2c1   : > { %v1897_v48 = vadd.f32 %v1896_v19, %v1895_v2 }
 0x2c2   : > { %v1923_v46 = vadd.f32 %v1922_v29, %v1921_v0 }
 0x2c3   : > { %v1985_v35 = vcombine.low %v1884_v62, %v1897_v48 }
 0x2c4   : > { %v1986_v59 = vcombine.low %v1910_v42, %v1923_v46 }
 0x2c5   : > { %v1993_v50 = vrot.slane %v1985_v35, %v3826_v11 }
 0x2c6   : > { %v2000_v3 = vrot.slane %v1986_v59, %v3826_v11 }
 0x2c8   : > { %v2001_v54 = vcombine.low %v1993_v50, %v2000_v3 }
 0x2ca   : > { %v2008_v7 = vrot.slane %v2001_v54, %v3826_v11 }
 0x2cc   : > { %v2012_v36 = vadd.f32 %v2008_v7, %v1767_v34 }
 0x2ce   : > { %2018 = vst.msk [vmem:[#allocation2 + $0x8] sm:$0xf] %vm3431_vm5, %v2012_v36 }
 0x2d5   : > { %v2023_v40 = vld [vmem:[#allocation2 + $0x8] sm:$0xf] }
 0x2d6   : > { %v2025_v10 = vmul.f32 0.015625, %v2023_v40 }
 0x2d8   : > { %2027 = vst.msk [vmem:[%s3656_s17 + $0x8] sm:$0xf] %vm3431_vm5, %v2025_v10 }
 0x2d9 PF: > { %s15_s14 = sadd.s32 1, %s2936_s14   ;;  %s3847_s12 = smov %s2932_s13 }
 0x2da   : > { %p12_p3 = scmp.ge.s32.totalorder %s15_s14, 4   ;;  %s3848_s13 = smov %s3850_s16 }
 0x2dc   :  { %14 = sbr.rel (!%p12_p3) target bundleno = 3 (0x3), region = 79 }
 0x2e1   :  { %2047 = vsyncpa [#allocation4], 1 }
 0x2e2   :  { %2049 = vsyncpa [#allocation4 + $0x1], 1 }
 0x2e3   :  { %2050 = vsyncpa [#allocation6], 1 }

// kernel: forward.3
= control target key start
LH: loop header
LB: loop body
LE: loop exit
PB: predicated region body
PF: predicated region fallthrough
CT: control target
= control target key end

     0   :  { %10 = vsyncpa [#allocation4], 0  ;;  %s2209_s18 = smov 0   ;;  %s2518_s0 = inlined_call_operand.vmem [shape: bf16[2,1536], index: 0, kind: input, shape index: {}]   ;;  %s2519_s1 = inlined_call_operand.vmem [shape: bf16[1536,480], index: 1, kind: input, shape index: {}]   ;;  %s2520_s2 = inlined_call_operand.vmem [shape: f32[1,480], index: 2, kind: input, shape index: {}]   ;;  %s2521_s3 = inlined_call_operand.vmem [shape: bf16[480,5], index: 3, kind: input, shape index: {}]   ;;  %s2522_s4 = inlined_call_operand.vmem [shape: f32[1,5], index: 4, kind: input, shape index: {}]   ;;  %s2523_s5 = inlined_call_operand.hbm [shape: f32[2,5], index: 5, kind: output, shape index: {}]  }
   0x1 LB: > { %s2215_s19 = sadd.s32 4294967295, %s2172_s18   ;;  %p1702_p0 = scmp.ge.s32.totalorder %s2172_s18, 1  ;;  %s2172_s18 = sphi %s2209_s18, %s16_s18  }
   0x2   : > { %p195_p1 = scmp.lt.s32.totalorder %s2172_s18, 4 }
   0x4   : > { %p196_p2 = pnand %p1702_p0, %p195_p1 }
   0x5   : > { %s1703_s20 = sshll.u32 (!%p196_p2), %s2215_s19, 2  ;;  %s1704_s21 = sshll.u32 (!%p196_p2), %s2215_s19, 6 }
   0x6   : > { %199 = sbr.rel (%p196_p2) target bundleno = 630 (0x276), region = 40  ;;  %p224_p3 = scmp.lt.s32.totalorder (!%p196_p2), %s1703_s20, 11 }
   0x7   : > { %p229_p4 = scmp.lt.s32.totalorder (!%p196_p2), %s1704_s21, 191  ;;  %p1707_p5 = scmp.ne.s32.totalorder (!%p196_p2), %s2215_s19, 0 }
   0xb   : > { %s2525_s20 = smov (!%p224_p3, %s1703_s20), 11  ;;  %s2527_s21 = smov (!%p229_p4, %s1704_s21), 191 }
   0xc   : > { %s226_s24 = scalar_lea.vmem %s2518_s0, %s2525_s20  ;;  %s1874_s25 = sshll.u32 %s2527_s21, 4 }
   0xd   : > { %s2230_s28 = scalar_lea.vmem %s2519_s1, %s1874_s25  ;;  %239 = sbr.rel (%p1707_p5) target bundleno = 23 (0x17), region = 44 }
  0x12   : > { %vm240_vm0 = vcmask 1041408   ;;  %vm241_vm1 = vcmask 1043458   ;;  %vm243_vm2 = vcmask 1045508   ;;  %vm245_vm3 = vcmask 785414  }
  0x13   : > { %vm242_vm4 = vmor %vm241_vm1, %vm240_vm0  ;;  %v2174_v0 = vmov 0.0  }
  0x14   : > { %vm244_vm5 = vmor %vm243_vm2, %vm242_vm4 }
  0x15   : > { %vm246_vm6 = vmor %vm245_vm3, %vm244_vm5 }
  0x16   : > { %247 = vst.msk [vmem:[#allocation2] sm:$0xff] %vm246_vm6, %v2174_v0 }
  0x17 PF: > { %v1916_v1 = vld [vmem:[%s2230_s28 + $0xe4] ss:$16 sps:$4 sm:$0xff]   ;;  %v1920_v3 = vld [vmem:[%s2230_s28 + $0xe0] ss:$16 sps:$4 sm:$0xff]   ;;  %v2175_v39 = vmov 1966171168   ;;  %v390_v41 = vlaneseq }
  0x18   : > { %v1918_v2 = vld [vmem:[%s2230_s28 + $0x2e4] ss:$16 sps:$4 sm:$0xff]   ;;  %1047 = vmatprep.subr.bf16.mxu0 %v1916_v1  ;;  %v1921_v4 = vld [vmem:[%s2230_s28 + $0x2e0] ss:$16 sps:$4 sm:$0xff]   ;;  %v388_v40 = vunpack.c.l.s4 %v2175_v39  ;;  %v2048_v39 = vld [vmem:[%s2230_s28 + $0x28] ss:$16 sps:$4 sm:$0xff]  }
  0x19   : > { %1088 = vmatprep.subr.bf16.mxu1 %v1918_v2  ;;  %v1922_v5 = vld [vmem:[%s2230_s28 + $0xc4] ss:$16 sps:$4 sm:$0xff]   ;;  %1048 = vmatpush1.bf16.msra.mxu0 %v1920_v3  ;;  %v1926_v7 = vld [vmem:[%s2230_s28 + $0xc0] ss:$16 sps:$4 sm:$0xff]   ;;  %v2275_v47 = vshrl.u32 %v390_v41, 7  ;;  %vm1234_vm7 = vcmask 1041408  }
  0x1a   : > { %1089 = vmatpush1.bf16.msra.mxu1 %v1921_v4  ;;  %v1924_v6 = vld [vmem:[%s2230_s28 + $0x2c4] ss:$16 sps:$4 sm:$0xff]   ;;  %1049 = vmatprep.subr.bf16.mxu0 %v1922_v5  ;;  %v1927_v8 = vld [vmem:[%s2230_s28 + $0x2c0] ss:$16 sps:$4 sm:$0xff]   ;;  %v389_v46 = vunpack.c.0.s8 %v388_v40  ;;  %v2051_v40 = vld [vmem:[%s2230_s28 + $0x228] ss:$16 sps:$4 sm:$0xff]  }
  0x1b   : > { %1090 = vmatprep.subr.bf16.mxu1 %v1924_v6  ;;  %v1928_v9 = vld [vmem:[%s2230_s28 + $0xa4] ss:$16 sps:$4 sm:$0xff]   ;;  %v1932_v11 = vld [vmem:[%s2230_s28 + $0xa0] ss:$16 sps:$4 sm:$0xff]   ;;  %v2056_v41 = vld [vmem:[%s2230_s28 + $0xc] ss:$16 sps:$4 sm:$0xff]  }
  0x1c   : > { %v1930_v10 = vld [vmem:[%s2230_s28 + $0x2a4] ss:$16 sps:$4 sm:$0xff]   ;;  %v1933_v12 = vld [vmem:[%s2230_s28 + $0x2a0] ss:$16 sps:$4 sm:$0xff]   ;;  %v392_v52 = vsub.s32 %v389_v46, %v2275_v47  ;;  %v2065_v46 = vld [vmem:[%s2230_s28 + $0x3ec] ss:$16 sps:$4 sm:$0xff]  }
  0x1d   : > { %1050 = vmatpush1.bf16.msra.mxu0 %v1926_v7  ;;  %v1934_v13 = vld [vmem:[%s2230_s28 + $0x84] ss:$16 sps:$4 sm:$0xff]   ;;  %v1938_v15 = vld [vmem:[%s2230_s28 + $0x80] ss:$16 sps:$4 sm:$0xff]   ;;  %vm1235_vm8 = vcmask 1043458   ;;  %vm1237_vm10 = vcmask 1045508  }
  0x1e   : > { %1091 = vmatpush1.bf16.msra.mxu1 %v1927_v8  ;;  %1051 = vmatprep.subr.bf16.mxu0 %v1928_v9  ;;  %v1936_v14 = vld [vmem:[%s2230_s28 + $0x284] ss:$16 sps:$4 sm:$0xff]   ;;  %v1939_v16 = vld [vmem:[%s2230_s28 + $0x280] ss:$16 sps:$4 sm:$0xff]   ;;  %vm1236_vm9 = vmor %vm1235_vm8, %vm1234_vm7  ;;  %vm1239_vm12 = vcmask 785414   ;;  %p1837_p6 = scmp.ne.s32.totalorder %s2215_s19, 2 }
  0x1f   : > { %1092 = vmatprep.subr.bf16.mxu1 %v1930_v10  ;;  %v1940_v17 = vld [vmem:[%s2230_s28 + $0x64] ss:$16 sps:$4 sm:$0xff]   ;;  %v1944_v19 = vld [vmem:[%s2230_s28 + $0x60] ss:$16 sps:$4 sm:$0xff]   ;;  %vm1238_vm11 = vmor %vm1237_vm10, %vm1236_vm9 }
  0x20   : > { %v1942_v18 = vld [vmem:[%s2230_s28 + $0x264] ss:$16 sps:$4 sm:$0xff]   ;;  %v1945_v20 = vld [vmem:[%s2230_s28 + $0x260] ss:$16 sps:$4 sm:$0xff]   ;;  %vm1240_vm13 = vmor %vm1239_vm12, %vm1238_vm11 }
  0x21   : > { %1052 = vmatpush1.bf16.msra.mxu0 %v1932_v11  ;;  %v1946_v21 = vld [vmem:[%s2230_s28 + $0x44] ss:$16 sps:$4 sm:$0xff]   ;;  %v1950_v23 = vld [vmem:[%s2230_s28 + $0x40] ss:$16 sps:$4 sm:$0xff]  }
  0x22   : > { %1093 = vmatpush1.bf16.msra.mxu1 %v1933_v12  ;;  %1053 = vmatprep.subr.bf16.mxu0 %v1934_v13  ;;  %v1948_v22 = vld [vmem:[%s2230_s28 + $0x244] ss:$16 sps:$4 sm:$0xff]   ;;  %v1951_v24 = vld [vmem:[%s2230_s28 + $0x240] ss:$16 sps:$4 sm:$0xff]   ;;  %v2014_v12 = vld [vmem:[%s2230_s28 + $0xec] ss:$16 sps:$4 sm:$0xff]  }
  0x23   : > { %1094 = vmatprep.subr.bf16.mxu1 %v1936_v14  ;;  %v1952_v25 = vld [vmem:[%s2230_s28 + $0x24] ss:$16 sps:$4 sm:$0xff]   ;;  %v1956_v27 = vld [vmem:[%s2230_s28 + $0x20] ss:$16 sps:$4 sm:$0xff]   ;;  %v2017_v13 = vld [vmem:[%s2230_s28 + $0x2ec] ss:$16 sps:$4 sm:$0xff]  }
  0x24   : > { %v1954_v26 = vld [vmem:[%s2230_s28 + $0x224] ss:$16 sps:$4 sm:$0xff]   ;;  %v1957_v28 = vld [vmem:[%s2230_s28 + $0x220] ss:$16 sps:$4 sm:$0xff]  }
  0x25   : > { %1054 = vmatpush1.bf16.msra.mxu0 %v1938_v15  ;;  %v1958_v29 = vld [vmem:[%s2230_s28 + $0x4] ss:$16 sps:$4 sm:$0xff]   ;;  %v1962_v31 = vld [vmem:[%s2230_s28] ss:$16 sps:$4 sm:$0xff]   ;;  %v2012_v15 = vld [vmem:[%s2230_s28 + $0xe8] ss:$16 sps:$4 sm:$0xff]  }
  0x26   : > { %1095 = vmatpush1.bf16.msra.mxu1 %v1939_v16  ;;  %1055 = vmatprep.subr.bf16.mxu0 %v1940_v17  ;;  %v1960_v30 = vld [vmem:[%s2230_s28 + $0x204] ss:$16 sps:$4 sm:$0xff]   ;;  %v1963_v32 = vld [vmem:[%s2230_s28 + $0x200] ss:$16 sps:$4 sm:$0xff]   ;;  %v2015_v16 = vld [vmem:[%s2230_s28 + $0x2e8] ss:$16 sps:$4 sm:$0xff]  }
  0x27   : > { %1096 = vmatprep.subr.bf16.mxu1 %v1942_v18  ;;  %v1964_v33 = vld [vmem:[%s2230_s28 + $0x1e4] ss:$16 sps:$4 sm:$0xff]   ;;  %v1968_v35 = vld [vmem:[%s2230_s28 + $0x1e0] ss:$16 sps:$4 sm:$0xff]   ;;  %v2020_v17 = vld [vmem:[%s2230_s28 + $0xcc] ss:$16 sps:$4 sm:$0xff]  }
  0x28   : > { %v1966_v34 = vld [vmem:[%s2230_s28 + $0x3e4] ss:$16 sps:$4 sm:$0xff]   ;;  %v1969_v36 = vld [vmem:[%s2230_s28 + $0x3e0] ss:$16 sps:$4 sm:$0xff]   ;;  %v2023_v18 = vld [vmem:[%s2230_s28 + $0x2cc] ss:$16 sps:$4 sm:$0xff]  }
  0x29   : > { %1056 = vmatpush1.bf16.msra.mxu0 %v1944_v19  ;;  %v1970_v37 = vld [vmem:[%s2230_s28 + $0x1c4] ss:$16 sps:$4 sm:$0xff]   ;;  %v1974_v42 = vld [vmem:[%s2230_s28 + $0x1c0] ss:$16 sps:$4 sm:$0xff]   ;;  %v2018_v19 = vld [vmem:[%s2230_s28 + $0xc8] ss:$16 sps:$4 sm:$0xff]  }
  0x2a   : > { %1097 = vmatpush1.bf16.msra.mxu1 %v1945_v20  ;;  %1057 = vmatprep.subr.bf16.mxu0 %v1946_v21  ;;  %v1972_v38 = vld [vmem:[%s2230_s28 + $0x3c4] ss:$16 sps:$4 sm:$0xff]   ;;  %v1975_v43 = vld [vmem:[%s2230_s28 + $0x3c0] ss:$16 sps:$4 sm:$0xff]   ;;  %v2021_v20 = vld [vmem:[%s2230_s28 + $0x2c8] ss:$16 sps:$4 sm:$0xff]  }
  0x2b   : > { %1098 = vmatprep.subr.bf16.mxu1 %v1948_v22  ;;  %v1976_v44 = vld [vmem:[%s2230_s28 + $0x1a4] ss:$16 sps:$4 sm:$0xff]   ;;  %v1980_v48 = vld [vmem:[%s2230_s28 + $0x1a0] ss:$16 sps:$4 sm:$0xff]   ;;  %v2026_v21 = vld [vmem:[%s2230_s28 + $0xac] ss:$16 sps:$4 sm:$0xff]  }
  0x2c   : > { %v1978_v45 = vld [vmem:[%s2230_s28 + $0x3a4] ss:$16 sps:$4 sm:$0xff]   ;;  %v1981_v49 = vld [vmem:[%s2230_s28 + $0x3a0] ss:$16 sps:$4 sm:$0xff]   ;;  %v2029_v22 = vld [vmem:[%s2230_s28 + $0x2ac] ss:$16 sps:$4 sm:$0xff]  }
  0x2d   : > { %1058 = vmatpush1.bf16.msra.mxu0 %v1950_v23  ;;  %v1982_v50 = vld [vmem:[%s2230_s28 + $0x184] ss:$16 sps:$4 sm:$0xff]   ;;  %v1708_v53 = vld.sshfl [vmem:[%s226_s24] sm:$0x33 pattern:$0x75316420] }
  0x2e   : > { %1099 = vmatpush1.bf16.msra.mxu1 %v1951_v24  ;;  %1059 = vmatprep.subr.bf16.mxu0 %v1952_v25  ;;  %v1984_v51 = vld [vmem:[%s2230_s28 + $0x384] ss:$16 sps:$4 sm:$0xff]   ;;  %v1986_v54 = vld [vmem:[%s2230_s28 + $0x180] ss:$16 sps:$4 sm:$0xff]   ;;  %v386_v56 = vcombine.high %v1708_v53, %v1708_v53  ;;  %v2304_v10 = vrot.slane %v1708_v53, %v392_v52  ;;  %v2024_v23 = vld [vmem:[%s2230_s28 + $0xa8] ss:$16 sps:$4 sm:$0xff]  }
  0x2f   : > { %1100 = vmatprep.subr.bf16.mxu1 %v1954_v26  ;;  %v1987_v55 = vld [vmem:[%s2230_s28 + $0x380] ss:$16 sps:$4 sm:$0xff]   ;;  %v1988_v57 = vld [vmem:[%s2230_s28 + $0x164] ss:$16 sps:$4 sm:$0xff]   ;;  %v2027_v24 = vld [vmem:[%s2230_s28 + $0x2a8] ss:$16 sps:$4 sm:$0xff]  }
  0x30   : > { %v1990_v58 = vld [vmem:[%s2230_s28 + $0x364] ss:$16 sps:$4 sm:$0xff]   ;;  %v400_v59 = vrot.slane %v386_v56, %v392_v52  ;;  %v1992_v60 = vld [vmem:[%s2230_s28 + $0x160] ss:$16 sps:$4 sm:$0xff]   ;;  %v2311_v14 = vcombine.high %v2304_v10, %v2304_v10  ;;  %v2032_v25 = vld [vmem:[%s2230_s28 + $0x8c] ss:$16 sps:$4 sm:$0xff]  }
  0x31   : > { %1060 = vmatpush1.bf16.msra.mxu0 %v1956_v27  ;;  %v1993_v61 = vld [vmem:[%s2230_s28 + $0x360] ss:$16 sps:$4 sm:$0xff]   ;;  %v1994_v63 = vld [vmem:[%s2230_s28 + $0x144] ss:$16 sps:$4 sm:$0xff]   ;;  %v2035_v26 = vld [vmem:[%s2230_s28 + $0x28c] ss:$16 sps:$4 sm:$0xff]  }
  0x32   : > { %1101 = vmatpush1.bf16.msra.mxu1 %v1957_v28  ;;  %1061 = vmatprep.subr.bf16.mxu0 %v1958_v29  ;;  %v402_v62 = vcombine.high %v400_v59, %v400_v59  ;;  %v1996_v0 = vld [vmem:[%s2230_s28 + $0x344] ss:$16 sps:$4 sm:$0xff]   ;;  %v1998_v1 = vld [vmem:[%s2230_s28 + $0x140] ss:$16 sps:$4 sm:$0xff]   ;;  %v2030_v27 = vld [vmem:[%s2230_s28 + $0x88] ss:$16 sps:$4 sm:$0xff]  }
  0x33   : > { %1102 = vmatprep.subr.bf16.mxu1 %v1960_v30  ;;  %1079 = vmatprep.mubr.bf16.mxu0 %v400_v59  ;;  %v1999_v2 = vld [vmem:[%s2230_s28 + $0x340] ss:$16 sps:$4 sm:$0xff]   ;;  %v2000_v3 = vld [vmem:[%s2230_s28 + $0x124] ss:$16 sps:$4 sm:$0xff]   ;;  %v2033_v28 = vld [vmem:[%s2230_s28 + $0x288] ss:$16 sps:$4 sm:$0xff]  }
  0x34   : > { %1120 = vmatprep.mubr.bf16.mxu1 %v402_v62  ;;  %v2002_v4 = vld [vmem:[%s2230_s28 + $0x324] ss:$16 sps:$4 sm:$0xff]   ;;  %v2004_v5 = vld [vmem:[%s2230_s28 + $0x120] ss:$16 sps:$4 sm:$0xff]   ;;  %v2038_v29 = vld [vmem:[%s2230_s28 + $0x6c] ss:$16 sps:$4 sm:$0xff]  }
  0x35   : > { %1062 = vmatpush1.bf16.msra.mxu0 %v1962_v31  ;;  %v2005_v6 = vld [vmem:[%s2230_s28 + $0x320] ss:$16 sps:$4 sm:$0xff]   ;;  %v2006_v7 = vld [vmem:[%s2230_s28 + $0x104] ss:$16 sps:$4 sm:$0xff]   ;;  %v2041_v30 = vld [vmem:[%s2230_s28 + $0x26c] ss:$16 sps:$4 sm:$0xff]  }
  0x36   : > { %1103 = vmatpush1.bf16.msra.mxu1 %v1963_v32  ;;  %1063 = vmatprep.subr.bf16.mxu0 %v1964_v33  ;;  %v2008_v8 = vld [vmem:[%s2230_s28 + $0x304] ss:$16 sps:$4 sm:$0xff]   ;;  %v2010_v9 = vld [vmem:[%s2230_s28 + $0x100] ss:$16 sps:$4 sm:$0xff]   ;;  %v2036_v31 = vld [vmem:[%s2230_s28 + $0x68] ss:$16 sps:$4 sm:$0xff]  }
  0x37   : > { %1104 = vmatprep.subr.bf16.mxu1 %v1966_v34  ;;  %v2011_v11 = vld [vmem:[%s2230_s28 + $0x300] ss:$16 sps:$4 sm:$0xff]   ;;  %v2039_v32 = vld [vmem:[%s2230_s28 + $0x268] ss:$16 sps:$4 sm:$0xff]   ;;  %v2044_v33 = vld [vmem:[%s2230_s28 + $0x4c] ss:$16 sps:$4 sm:$0xff]  }
  0x38   : > { %v2047_v34 = vld [vmem:[%s2230_s28 + $0x24c] ss:$16 sps:$4 sm:$0xff]   ;;  %v2066_v52 = vld [vmem:[%s2230_s28 + $0x1c8] ss:$16 sps:$4 sm:$0xff]  }
  0x39   : > { %1064 = vmatpush2.bf16.msra.mxu0 %v1968_v35  ;;  %v2042_v35 = vld [vmem:[%s2230_s28 + $0x48] ss:$16 sps:$4 sm:$0xff]  }
  0x3a   : > { %1105 = vmatpush2.bf16.msra.mxu1 %v1969_v36  ;;  %1065 = vmatprep.subr.bf16.mxu0 %v1970_v37  ;;  %v2045_v36 = vld [vmem:[%s2230_s28 + $0x248] ss:$16 sps:$4 sm:$0xff]   ;;  %v2050_v37 = vld [vmem:[%s2230_s28 + $0x2c] ss:$16 sps:$4 sm:$0xff]  }
  0x3b   : > { %1106 = vmatprep.subr.bf16.mxu1 %v1972_v38  ;;  %v2053_v38 = vld [vmem:[%s2230_s28 + $0x22c] ss:$16 sps:$4 sm:$0xff]   ;;  %v2069_v53 = vld [vmem:[%s2230_s28 + $0x3c8] ss:$16 sps:$4 sm:$0xff]  }
  0x3c   : > { %v2072_v56 = vld [vmem:[%s2230_s28 + $0x1a8] ss:$16 sps:$4 sm:$0xff]  }
  0x3d   : > { %1066 = vmatpush2.bf16.msra.mxu0 %v1974_v42  ;;  %v2059_v42 = vld [vmem:[%s2230_s28 + $0x20c] ss:$16 sps:$4 sm:$0xff]  }
  0x3e   : > { %1107 = vmatpush2.bf16.msra.mxu1 %v1975_v43  ;;  %1067 = vmatprep.subr.bf16.mxu0 %v1976_v44  ;;  %v2054_v43 = vld [vmem:[%s2230_s28 + $0x8] ss:$16 sps:$4 sm:$0xff]  }
  0x3f   : > { %1108 = vmatprep.subr.bf16.mxu1 %v1978_v45  ;;  %v2057_v44 = vld [vmem:[%s2230_s28 + $0x208] ss:$16 sps:$4 sm:$0xff]   ;;  %v2062_v45 = vld [vmem:[%s2230_s28 + $0x1ec] ss:$16 sps:$4 sm:$0xff]  }
  0x41   : > { %1068 = vmatpush2.bf16.msra.mxu0 %v1980_v48  ;;  %v2060_v48 = vld [vmem:[%s2230_s28 + $0x1e8] ss:$16 sps:$4 sm:$0xff]  }
  0x42   : > { %1109 = vmatpush2.bf16.msra.mxu1 %v1981_v49  ;;  %1069 = vmatprep.subr.bf16.mxu0 %v1982_v50  ;;  %v2063_v49 = vld [vmem:[%s2230_s28 + $0x3e8] ss:$16 sps:$4 sm:$0xff]   ;;  %v2068_v50 = vld [vmem:[%s2230_s28 + $0x1cc] ss:$16 sps:$4 sm:$0xff]  }
  0x43   : > { %1110 = vmatprep.subr.bf16.mxu1 %v1984_v51  ;;  %v2071_v51 = vld [vmem:[%s2230_s28 + $0x3cc] ss:$16 sps:$4 sm:$0xff]  }
  0x45   : > { %1070 = vmatpush2.bf16.msra.mxu0 %v1986_v54  ;;  %v2074_v54 = vld [vmem:[%s2230_s28 + $0x1ac] ss:$16 sps:$4 sm:$0xff]  }
  0x46   : > { %1111 = vmatpush2.bf16.msra.mxu1 %v1987_v55  ;;  %1071 = vmatprep.subr.bf16.mxu0 %v1988_v57  ;;  %v2077_v55 = vld [vmem:[%s2230_s28 + $0x3ac] ss:$16 sps:$4 sm:$0xff]   ;;  %v2075_v57 = vld [vmem:[%s2230_s28 + $0x3a8] ss:$16 sps:$4 sm:$0xff]  }
  0x47   : > { %1112 = vmatprep.subr.bf16.mxu1 %v1990_v58  ;;  %v2080_v58 = vld [vmem:[%s2230_s28 + $0x18c] ss:$16 sps:$4 sm:$0xff]  }
  0x49   : > { %1072 = vmatpush2.bf16.msra.mxu0 %v1992_v60  ;;  %v2078_v60 = vld [vmem:[%s2230_s28 + $0x188] ss:$16 sps:$4 sm:$0xff]  }
  0x4a   : > { %1113 = vmatpush2.bf16.msra.mxu1 %v1993_v61  ;;  %1073 = vmatprep.subr.bf16.mxu0 %v1994_v63  ;;  %v2081_v61 = vld [vmem:[%s2230_s28 + $0x388] ss:$16 sps:$4 sm:$0xff]   ;;  %v2089_v63 = vld [vmem:[%s2230_s28 + $0x36c] ss:$16 sps:$4 sm:$0xff]  }
  0x4b   : > { %1114 = vmatprep.subr.bf16.mxu1 %v1996_v0  ;;  %v2084_v0 = vld [vmem:[%s2230_s28 + $0x168] ss:$16 sps:$4 sm:$0xff]  }
  0x4d   : > { %1074 = vmatpush2.bf16.msra.mxu0 %v1998_v1  ;;  %v2087_v1 = vld [vmem:[%s2230_s28 + $0x368] ss:$16 sps:$4 sm:$0xff]  }
  0x4e   : > { %1115 = vmatpush2.bf16.msra.mxu1 %v1999_v2  ;;  %1075 = vmatprep.subr.bf16.mxu0 %v2000_v3  ;;  %v2092_v2 = vld [vmem:[%s2230_s28 + $0x14c] ss:$16 sps:$4 sm:$0xff]  }
  0x4f   : > { %1116 = vmatprep.subr.bf16.mxu1 %v2002_v4  ;;  %v2095_v3 = vld [vmem:[%s2230_s28 + $0x34c] ss:$16 sps:$4 sm:$0xff]   ;;  %v2090_v4 = vld [vmem:[%s2230_s28 + $0x148] ss:$16 sps:$4 sm:$0xff]  }
  0x51   : > { %1076 = vmatpush2.bf16.msra.mxu0 %v2004_v5  ;;  %v2093_v5 = vld [vmem:[%s2230_s28 + $0x348] ss:$16 sps:$4 sm:$0xff]  }
  0x52   : > { %1117 = vmatpush2.bf16.msra.mxu1 %v2005_v6  ;;  %1077 = vmatprep.subr.bf16.mxu0 %v2006_v7  ;;  %v2098_v6 = vld [vmem:[%s2230_s28 + $0x12c] ss:$16 sps:$4 sm:$0xff]  }
  0x53   : > { %1118 = vmatprep.subr.bf16.mxu1 %v2008_v8  ;;  %v2101_v7 = vld [vmem:[%s2230_s28 + $0x32c] ss:$16 sps:$4 sm:$0xff]   ;;  %v2096_v8 = vld [vmem:[%s2230_s28 + $0x128] ss:$16 sps:$4 sm:$0xff]  }
  0x55   : > { %1078 = vmatpush2.bf16.msra.mxu0 %v2010_v9  ;;  %v2099_v9 = vld [vmem:[%s2230_s28 + $0x328] ss:$16 sps:$4 sm:$0xff]  }
  0x56   : > { %1119 = vmatpush2.bf16.msra.mxu1 %v2011_v11  ;;  %1129 = vmatprep.subr.bf16.mxu0 %v2014_v12  ;;  %v2104_v11 = vld [vmem:[%s2230_s28 + $0x10c] ss:$16 sps:$4 sm:$0xff]  }
  0x57   : > { %1170 = vmatprep.subr.bf16.mxu1 %v2017_v13  ;;  %v2107_v12 = vld [vmem:[%s2230_s28 + $0x30c] ss:$16 sps:$4 sm:$0xff]   ;;  %v2102_v13 = vld [vmem:[%s2230_s28 + $0x108] ss:$16 sps:$4 sm:$0xff]  }
  0x58   : > { %1080 = vmatmul.mubr.bf16.vlgmr.msra.gmra.mxu0 %v2304_v10 }
  0x59   : > { %1121 = vmatmul.mubr.bf16.vlgmr.msra.gmra.mxu1 %v2311_v14  ;;  %1130 = vmatpush1.bf16.msra.mxu0 %v2012_v15  ;;  %v2105_v15 = vld [vmem:[%s2230_s28 + $0x308] ss:$16 sps:$4 sm:$0xff]  }
  0x5a   : > { %1171 = vmatpush1.bf16.msra.mxu1 %v2015_v16  ;;  %1131 = vmatprep.subr.bf16.mxu0 %v2020_v17 }
  0x5b   : > { %1172 = vmatprep.subr.bf16.mxu1 %v2023_v18  ;;  %1161 = vmatprep.mubr.bf16.mxu0 %v400_v59  ;;  %v2083_v59 = vld [vmem:[%s2230_s28 + $0x38c] ss:$16 sps:$4 sm:$0xff]  }
  0x5c   : > { %1202 = vmatprep.mubr.bf16.mxu1 %v402_v62  ;;  %v2086_v62 = vld [vmem:[%s2230_s28 + $0x16c] ss:$16 sps:$4 sm:$0xff]  }
  0x5d   : > { %1132 = vmatpush1.bf16.msra.mxu0 %v2018_v19 }
  0x5e   : > { %1173 = vmatpush1.bf16.msra.mxu1 %v2021_v20  ;;  %1133 = vmatprep.subr.bf16.mxu0 %v2026_v21 }
  0x5f   : > { %1174 = vmatprep.subr.bf16.mxu1 %v2029_v22 }
  0x61   : > { %1134 = vmatpush1.bf16.msra.mxu0 %v2024_v23 }
  0x62   : > { %1175 = vmatpush1.bf16.msra.mxu1 %v2027_v24  ;;  %1135 = vmatprep.subr.bf16.mxu0 %v2032_v25 }
  0x63   : > { %1176 = vmatprep.subr.bf16.mxu1 %v2035_v26 }
  0x65   : > { %1136 = vmatpush1.bf16.msra.mxu0 %v2030_v27  ;;  %v2176_v27 = vmov 1983009808  }
  0x66   : > { %1177 = vmatpush1.bf16.msra.mxu1 %v2033_v28  ;;  %1137 = vmatprep.subr.bf16.mxu0 %v2038_v29  ;;  %v1218_v28 = vunpack.c.l.s4 %v2176_v27 }
  0x67   : > { %1178 = vmatprep.subr.bf16.mxu1 %v2041_v30 }
  0x68   : > { %v1219_v29 = vunpack.c.0.s8 %v1218_v28 }
  0x69   : > { %1138 = vmatpush1.bf16.msra.mxu0 %v2036_v31 }
  0x6a   : > { %1179 = vmatpush1.bf16.msra.mxu1 %v2039_v32  ;;  %1139 = vmatprep.subr.bf16.mxu0 %v2044_v33  ;;  %v2380_v32 = vsub.s32 %v1219_v29, %v2275_v47 }
  0x6b   : > { %1180 = vmatprep.subr.bf16.mxu1 %v2047_v34 }
  0x6d   : > { %1140 = vmatpush1.bf16.msra.mxu0 %v2042_v35 }
  0x6e   : > { %1181 = vmatpush1.bf16.msra.mxu1 %v2045_v36  ;;  %1141 = vmatprep.subr.bf16.mxu0 %v2050_v37 }
  0x6f   : > { %1182 = vmatprep.subr.bf16.mxu1 %v2053_v38 }
  0x71   : > { %1142 = vmatpush1.bf16.msra.mxu0 %v2048_v39 }
  0x72   : > { %1183 = vmatpush1.bf16.msra.mxu1 %v2051_v40  ;;  %1143 = vmatprep.subr.bf16.mxu0 %v2056_v41 }
  0x73   : > { %1184 = vmatprep.subr.bf16.mxu1 %v2059_v42  ;;  %v248_v42 = vld [vmem:[#allocation2] sm:$0xff] }
  0x75   : > { %1144 = vmatpush1.bf16.msra.mxu0 %v2054_v43 }
  0x76   : > { %1185 = vmatpush1.bf16.msra.mxu1 %v2057_v44  ;;  %1145 = vmatprep.subr.bf16.mxu0 %v2062_v45 }
  0x77   : > { %1186 = vmatprep.subr.bf16.mxu1 %v2065_v46 }
  0x79   : > { %1146 = vmatpush2.bf16.msra.mxu0 %v2060_v48 }
  0x7a   : > { %1187 = vmatpush2.bf16.msra.mxu1 %v2063_v49  ;;  %1147 = vmatprep.subr.bf16.mxu0 %v2068_v50 }
  0x7b   : > { %1188 = vmatprep.subr.bf16.mxu1 %v2071_v51 }
  0x7d   : > { %1148 = vmatpush2.bf16.msra.mxu0 %v2066_v52 }
  0x7e   : > { %1189 = vmatpush2.bf16.msra.mxu1 %v2069_v53  ;;  %1149 = vmatprep.subr.bf16.mxu0 %v2074_v54 }
  0x7f   : > { %1190 = vmatprep.subr.bf16.mxu1 %v2077_v55 }
  0x81   : > { %1150 = vmatpush2.bf16.msra.mxu0 %v2072_v56 }
  0x82   : > { %1191 = vmatpush2.bf16.msra.mxu1 %v2075_v57  ;;  %1151 = vmatprep.subr.bf16.mxu0 %v2080_v58 }
  0x83   : > { %1192 = vmatprep.subr.bf16.mxu1 %v2083_v59 }
  0x85   : > { %1152 = vmatpush2.bf16.msra.mxu0 %v2078_v60 }
  0x86   : > { %1193 = vmatpush2.bf16.msra.mxu1 %v2081_v61  ;;  %1153 = vmatprep.subr.bf16.mxu0 %v2086_v62 }
  0x87   : > { %1194 = vmatprep.subr.bf16.mxu1 %v2089_v63 }
  0x89   : > { %1154 = vmatpush2.bf16.msra.mxu0 %v2084_v0 }
  0x8a   : > { %1195 = vmatpush2.bf16.msra.mxu1 %v2087_v1  ;;  %1155 = vmatprep.subr.bf16.mxu0 %v2092_v2 }
  0x8b   : > { %1196 = vmatprep.subr.bf16.mxu1 %v2095_v3 }
  0x8d   : > { %1156 = vmatpush2.bf16.msra.mxu0 %v2090_v4 }
  0x8e   : > { %1197 = vmatpush2.bf16.msra.mxu1 %v2093_v5  ;;  %1157 = vmatprep.subr.bf16.mxu0 %v2098_v6 }
  0x8f   : > { %1198 = vmatprep.subr.bf16.mxu1 %v2101_v7 }
  0x91   : > { %1158 = vmatpush2.bf16.msra.mxu0 %v2096_v8 }
  0x92   : > { %1199 = vmatpush2.bf16.msra.mxu1 %v2099_v9  ;;  %1159 = vmatprep.subr.bf16.mxu0 %v2104_v11 }
  0x93   : > { %1200 = vmatprep.subr.bf16.mxu1 %v2107_v12 }
  0x95   : > { %1160 = vmatpush2.bf16.msra.mxu0 %v2102_v13 }
  0x96   : > { %1201 = vmatpush2.bf16.msra.mxu1 %v2105_v15 }
  0x98   : > { %1162 = vmatmul.mubr.bf16.vlgmr.msra.gmra.mxu0 %v2304_v10 }
  0x99   : > { %1203 = vmatmul.mubr.bf16.vlgmr.msra.gmra.mxu1 %v2311_v14 }
 0x118   : > { %v1081_v16 = vpop.f32.mrf.mxu0 }
 0x119   : > { %v1122_v17 = vpop.f32.mrf.mxu1 }
 0x11a   : > { %v1123_v18 = vadd.f32 %v1122_v17, %v1081_v16  ;;  %v1083_v19 = vpop.f32.mrf.mxu0 }
 0x11b   : > { %v1124_v20 = vpop.f32.mrf.mxu1 }
 0x11c   : > { %v1125_v21 = vadd.f32 %v1124_v20, %v1083_v19  ;;  %v1085_v22 = vpop.f32.mrf.mxu0 }
 0x11d   : > { %v1126_v23 = vpop.f32.mrf.mxu1 }
 0x11e   : > { %v1215_v24 = vcombine.low %v1123_v18, %v1125_v21  ;;  %v1086_v25 = vpop.f32.mrf.mxu0 }
 0x11f   : > { %v1127_v26 = vpop.f32.mrf.mxu1 }
 0x120   : > { %v1223_v40 = vrot.slane %v1215_v24, %v2380_v32 }
 0x158   : > { %v1163_v30 = vpop.f32.mrf.mxu0 }
 0x159   : > { %v1204_v31 = vpop.f32.mrf.mxu1 }
 0x15a   : > { %v1165_v10 = vpop.f32.mrf.mxu0  ;;  %v1205_v33 = vadd.f32 %v1204_v31, %v1163_v30 }
 0x15b   : > { %v1206_v14 = vpop.f32.mrf.mxu1 }
 0x15c   : > { %v1207_v34 = vadd.f32 %v1206_v14, %v1165_v10  ;;  %v1167_v35 = vpop.f32.mrf.mxu0 }
 0x15d   : > { %v1208_v36 = vpop.f32.mrf.mxu1 }
 0x15e   : > { %v1216_v37 = vcombine.low %v1205_v33, %v1207_v34  ;;  %v1168_v38 = vpop.f32.mrf.mxu0 }
 0x15f   : > { %v1209_v39 = vpop.f32.mrf.mxu1 }
 0x160   : > { %v1230_v41 = vrot.slane %v1216_v37, %v2380_v32 }
 0x162   : > { %v1231_v43 = vcombine.low %v1223_v40, %v1230_v41  ;;  %1245 = sbr.rel (%p1837_p6) target bundleno = 615 (0x267), region = 48 }
 0x164   : > { %v1233_v44 = vadd.f32 %v1231_v43, %v248_v42 }
 0x166   : > { %1241 = vst.msk [vmem:[#allocation2] sm:$0xff] %vm1240_vm13, %v1233_v44 }
 0x167   : > { %v2108_v45 = vld [vmem:[%s2521_s3 + $0xb8] sm:$0xff]   ;;  %v2177_v46 = vmov 0   ;;  %v2109_v48 = vld [vmem:[%s2521_s3 + $0xb0] sm:$0xff]   ;;  %v2110_v51 = vld [vmem:[%s2521_s3 + $0xa8] sm:$0xff]   ;;  %v1251_v2 = vsub.s32 0, %v2275_v47  ;;  %v1255_v4 = vsub.s32 1, %v2275_v47 }
 0x168   : > { %1602 = vmatprep.subr.bf16.mxu1 %v2177_v46  ;;  %v2112_v49 = vld [vmem:[%s2521_s3 + $0x78] sm:$0xff]   ;;  %v2115_v52 = vld [vmem:[%s2521_s3 + $0x70] sm:$0xff]   ;;  %v2111_v54 = vld [vmem:[%s2521_s3 + $0xa0] sm:$0xff]   ;;  %v1259_v5 = vsub.s32 2, %v2275_v47  ;;  %v1263_v6 = vsub.s32 3, %v2275_v47  ;;  %vm1558_vm14 = vcmask 785408  }
 0x169   : > { %1603 = vmatpush1.bf16.msra.mxu1 %v2108_v45  ;;  %v2113_v50 = vld [vmem:[%s2521_s3 + $0x38] sm:$0xff]   ;;  %1875 = vmatprep.subr.bf16.mxu0 %v2112_v49  ;;  %v2116_v53 = vld [vmem:[%s2521_s3 + $0x30] sm:$0xff]   ;;  %v2118_v55 = vld [vmem:[%s2521_s3 + $0x68] sm:$0xff]   ;;  %vm1642_vm15 = vcmask 33792  }
 0x16a   : > { %1604 = vmatprep.subr.bf16.mxu1 %v2177_v46  ;;  %1876 = vmatpush3.bf16.msra.mxu0 %v2113_v50  ;;  %v2119_v56 = vld [vmem:[%s2521_s3 + $0x28] sm:$0xff]   ;;  %v2121_v57 = vld [vmem:[%s2521_s3 + $0x60] sm:$0xff]   ;;  %v2114_v58 = vld [vmem:[%s2521_s3 + $0x98] sm:$0xff]  }
 0x16b   : > { %1877 = vmatprep.subr.bf16.mxu0 %v2115_v52  ;;  %v2122_v59 = vld [vmem:[%s2521_s3 + $0x20] sm:$0xff]   ;;  %v2124_v60 = vld [vmem:[%s2521_s3 + $0x58] sm:$0xff]   ;;  %v2117_v61 = vld [vmem:[%s2521_s3 + $0x90] sm:$0xff]  }
 0x16c   : > { %v2125_v62 = vld [vmem:[%s2521_s3 + $0x18] sm:$0xff]   ;;  %v2127_v63 = vld [vmem:[%s2521_s3 + $0x50] sm:$0xff]   ;;  %v2120_v0 = vld [vmem:[%s2521_s3 + $0x88] sm:$0xff]  }
 0x16d   : > { %1605 = vmatpush1.bf16.msra.mxu1 %v2109_v48  ;;  %v2128_v1 = vld [vmem:[%s2521_s3 + $0x10] sm:$0xff]   ;;  %v2130_v3 = vld [vmem:[%s2521_s3 + $0x48] sm:$0xff]   ;;  %v2123_v7 = vld [vmem:[%s2521_s3 + $0x80] sm:$0xff]  }
 0x16e   : > { %1606 = vmatprep.subr.bf16.mxu1 %v2177_v46  ;;  %1878 = vmatpush3.bf16.msra.mxu0 %v2116_v53  ;;  %v2131_v8 = vld [vmem:[%s2521_s3 + $0x8] sm:$0xff]   ;;  %v2133_v9 = vld [vmem:[%s2521_s3 + $0x40] sm:$0xff]   ;;  %v2132_v26 = vld [vmem:[%s2521_s3 + $0xd8] sm:$0xff]  }
 0x16f   : > { %1879 = vmatprep.subr.bf16.mxu0 %v2118_v55  ;;  %v1247_v47 = vld [vmem:[%s2520_s2] sm:$0xf]  ;;  %v2126_v16 = vld [vmem:[%s2521_s3 + $0xe8] sm:$0xff]   ;;  %v2135_v30 = vld [vmem:[%s2521_s3 + $0xd0] sm:$0xff]  }
 0x170   : > { %v1252_v11 = vrot.slane %v1247_v47, %v1251_v2  ;;  %v1256_v12 = vrot.slane %v1247_v47, %v1255_v4  ;;  %v1260_v13 = vrot.slane %v1247_v47, %v1259_v5  ;;  %v1264_v15 = vrot.slane %v1247_v47, %v1263_v6  ;;  %v2134_v17 = vld [vmem:[%s2521_s3] sm:$0xff]   ;;  %v2136_v35 = vld [vmem:[%s2521_s3 + $0xc8] sm:$0xff]  }
 0x171   : > { %1607 = vmatpush1.bf16.msra.mxu1 %v2110_v51  ;;  %v2129_v22 = vld [vmem:[%s2521_s3 + $0xe0] sm:$0xff]  }
 0x172   : > { %1608 = vmatprep.subr.bf16.mxu1 %v2177_v46  ;;  %1880 = vmatpush3.bf16.msra.mxu0 %v2119_v56  ;;  %v1265_v18 = vcombine.low %v1252_v11, %v1256_v12  ;;  %v1266_v19 = vcombine.low %v1260_v13, %v1264_v15  ;;  %v1246_v23 = vld [vmem:[#allocation2] sm:$0xff] }
 0x173   : > { %1881 = vmatprep.subr.bf16.mxu0 %v2121_v57  ;;  %v1838_v41 = vld [vmem:[%s2522_s4] ss:$0 sm:$0xff] }
 0x174   : > { %v1273_v20 = vrot.slane %v1265_v18, %v2380_v32  ;;  %v1280_v21 = vrot.slane %v1266_v19, %v2380_v32 }
 0x175   : > { %1609 = vmatpush1.bf16.msra.mxu1 %v2111_v54 }
 0x176   : > { %1610 = vmatprep.subr.bf16.mxu1 %v2177_v46  ;;  %1882 = vmatpush3.bf16.msra.mxu0 %v2122_v59  ;;  %v1281_v24 = vcombine.low %v1273_v20, %v1280_v21 }
 0x177   : > { %1883 = vmatprep.subr.bf16.mxu0 %v2124_v60 }
 0x178   : > { %v1283_v25 = vadd.f32 %v1281_v24, %v1246_v23 }
 0x179   : > { %1611 = vmatpush1.bf16.msra.mxu1 %v2114_v58 }
 0x17a   : > { %1612 = vmatprep.subr.bf16.mxu1 %v2177_v46  ;;  %1884 = vmatpush3.bf16.msra.mxu0 %v2125_v62  ;;  %v1284_v27 = vmax.f32 %v1283_v25, 0.0 }
 0x17b   : > { %1885 = vmatprep.subr.bf16.mxu0 %v2127_v63 }
 0x17c   : > { %v1293_v28 = vrot.slane %v1284_v27, %v2380_v32  ;;  %v1286_v29 = vcombine.high %v1284_v27, %v1284_v27 }
 0x17d   : > { %1613 = vmatpush1.bf16.msra.mxu1 %v2117_v61 }
 0x17e   : > { %1614 = vmatprep.subr.bf16.mxu1 %v2177_v46  ;;  %1886 = vmatpush3.bf16.msra.mxu0 %v2128_v1  ;;  %v1301_v31 = vcombine.high %v1293_v28, %v1293_v28  ;;  %v1300_v10 = vrot.slane %v1286_v29, %v2380_v32  ;;  %v1307_v14 = vpack.c.bf16 %v1293_v28, %v1293_v28  ;;  %v2137_v32 = vld [vmem:[%s2521_s3 + $0xc0] sm:$0xff]  }
 0x17f   : > { %1887 = vmatprep.subr.bf16.mxu0 %v2130_v3 }
 0x180   : > { %v1308_v33 = vpack.c.bf16 %v1301_v31, %v1301_v31  ;;  %v1302_v34 = vcombine.high %v1300_v10, %v1300_v10  ;;  %v1309_v37 = vpack.c.bf16 %v1300_v10, %v1300_v10 }
 0x181   : > { %1615 = vmatpush1.bf16.msra.mxu1 %v2120_v0 }
 0x182   : > { %1616 = vmatprep.subr.bf16.mxu1 %v2177_v46  ;;  %1888 = vmatpush3.bf16.msra.mxu0 %v2131_v8  ;;  %v1310_v36 = vpack.c.bf16 %v1302_v34, %v1302_v34 }
 0x183   : > { %1889 = vmatprep.subr.bf16.mxu0 %v2133_v9  ;;  %1594 = vmatprep.mubr.bf16.mxu0 %v1308_v33 }
 0x184   : > { %1869 = vmatprep.mubr.msk.bf16.mxu1 %vm1558_vm14, %v1310_v36 }
 0x185   : > { %1617 = vmatpush1.bf16.msra.mxu1 %v2123_v7 }
 0x186   : > { %1622 = vmatprep.subr.bf16.mxu1 %v2177_v46  ;;  %1890 = vmatpush3.bf16.msra.mxu0 %v2134_v17 }
 0x189   : > { %1623 = vmatpush2.bf16.msra.mxu1 %v2126_v16  ;;  %1595 = vmatmul.mubr.bf16.vlgmr.msra.gmra.mxu0 %v1307_v14 }
 0x18a   : > { %1624 = vmatprep.subr.bf16.mxu1 %v2177_v46 }
 0x18d   : > { %1625 = vmatpush2.bf16.msra.mxu1 %v2129_v22 }
 0x18e   : > { %1626 = vmatprep.subr.bf16.mxu1 %v2177_v46 }
 0x191   : > { %1627 = vmatpush2.bf16.msra.mxu1 %v2132_v26 }
 0x192   : > { %1628 = vmatprep.subr.bf16.mxu1 %v2177_v46 }
 0x195   : > { %1629 = vmatpush2.bf16.msra.mxu1 %v2135_v30 }
 0x196   : > { %1630 = vmatprep.subr.bf16.mxu1 %v2177_v46 }
 0x199   : > { %1631 = vmatpush2.bf16.msra.mxu1 %v2136_v35 }
 0x19a   : > { %1632 = vmatprep.subr.bf16.mxu1 %v2177_v46 }
 0x19d   : > { %1633 = vmatpush2.bf16.msra.mxu1 %v2137_v32 }
 0x1a0   : > { %1635 = vmatmul.mubr.bf16.vlgmr.msra.gmra.mxu1 %v1309_v37 }
 0x249   : > { %v1891_v38 = vpop.f32.mrf.mxu0 }
 0x24b   : > { %v1892_v39 = vpop.f32.mrf.mxu0 }
 0x24c   : > { %v1893_v40 = vadd.f32 %v1892_v39, %v1891_v38 }
 0x24d   : > { %v1894_v42 = vpop.f32.mrf.mxu0 }
 0x24e   : > { %v1597_v44 = vadd.f32 %v1893_v40, %v1838_v41 }
 0x24f   : > { %v1895_v43 = vpop.f32.mrf.mxu0 }
 0x260   : > { %v1636_v45 = vpop.f32.mrf.mxu1 }
 0x261   : > { %v1637_v48 = vadd.f32 %v1636_v45, %v1597_v44 }
 0x262   : > { %v1638_v49 = vpop.f32.mrf.mxu1 }
 0x263   : > { %1643 = vst.msk [vmem:[#allocation3] sm:$0x3] %vm1642_vm15, %v1637_v48 }
 0x264   : > { %v1639_v50 = vpop.f32.mrf.mxu1 }
 0x266   : > { %v1640_v46 = vpop.f32.mrf.mxu1 }
 0x267 PF: > { %p1901_p7 = scmp.eq.s32.totalorder %s2215_s19, 2  ;;  %s2178_s26 = smov [#allocation3]  }
 0x268   : > { %s1651_s27 = sshll.u32 %s2178_s26, 4  ;;  %s1652_s27 = int_to_ptr.vmem [resolvable:$true] %s1651_s27 }
 0x269   : > { %s2138_s28 = scalar_lea.vmem %s1652_s27, 32  ;;  %p2145_p11 = scmp.lt.s32.totalorder %s1652_s27, %s1652_s27 }
 0x26a   : > { %p2139_p8 = scmp.ne.s32.totalorder %s1652_s27, %s2138_s28  ;;  %p2146_p12 = scmp.lt.s32.totalorder %s2138_s28, %s2138_s28 }
 0x26c   : > { %p2140_p9 = pnand %p2139_p8, %p1901_p7  ;;  %p2147_p13 = por %p2146_p12, %p2145_p11 }
 0x26e   : > { %p2141_p10 = pneg %p2140_p9 }
 0x270   : > { %p2148_p0 = pnand %p2147_p13, %p2141_p10 }
 0x272   : > { %2151 = shalt.err (!%p2148_p0)
}
 0x273   : > { %1898 = dma.vmem_to_hbm [thread:$0]  (%p1901_p7), %s1652_s27, 32, %s2523_s5, [#allocation4]  }
 0x274   : > { %2167 = dma.done.wait (%p1901_p7), [#allocation4], 32  }
 0x275   : > { %2169 = vsyncadd (%p1901_p7), [#allocation4], 4294967264 }
 0x276 PF: > { %s16_s18 = sadd.s32 1, %s2172_s18  }
 0x277   : > { %p13_p1 = scmp.ge.s32.totalorder %s16_s18, 5  }
 0x279   :  { %15 = sbr.rel (!%p13_p1) target bundleno = 1 (0x1), region = 78 }
 0x27e   :  { %1664 = vsyncpa [#allocation4], 1 }
 0x27f   :  { %1666 = vsyncpa [#allocation4 + $0x1], 1 }

</bundles_post_ra>
